<compile_context>
chip_gen: v7x
topology: tpu7x:2x2x1
jax: 0.10.0
libtpu: 0.0.40
codegen_flags: <defaults>
</compile_context>

<pallas_src>
import math
import functools

import jax
import jax.numpy as jnp
from jax import lax
from jax.experimental import pallas as pl
from jax.experimental.pallas import tpu as pltpu


# ----------------------------- helpers -------------------------------------

def _round_up(x, m):
    return int(pl.cdiv(x, m) * m)


def _vmem_budgets():
    """Generation-aware (vmem_limit_bytes, per-call tile budget)."""
    vmem_bytes = 64 << 20
    try:
        info = pltpu.get_tpu_info()
        vmem_bytes = int(getattr(info, "vmem_capacity_bytes", vmem_bytes))
    except Exception:
        pass
    if vmem_bytes >= (128 << 20):       # v5e / v6e: use the big VMEM
        return 96 << 20, 44 << 20
    return 32 << 20, 20 << 20           # v7x-safe defaults


# ------------------------- generic tiled linear -----------------------------

def _make_linear_kernel(has_bias, has_residual, activation, compute_dtype):
    def kernel(*refs):
        refs = list(refs)
        x_ref = refs.pop(0)
        w_ref = refs.pop(0)
        b_ref = refs.pop(0) if has_bias else None
        r_ref = refs.pop(0) if has_residual else None
        o_ref = refs.pop(0)
        acc_ref = refs.pop(0)

        k = pl.program_id(2)

        @pl.when(k == 0)
        def _():
            acc_ref[...] = jnp.zeros_like(acc_ref)

        acc_ref[...] += jnp.dot(x_ref[...].astype(compute_dtype),
                                w_ref[...].astype(compute_dtype),
                                preferred_element_type=jnp.float32)

        @pl.when(k == pl.num_programs(2) - 1)
        def _():
            acc = acc_ref[...]
            if has_bias:
                acc = acc + b_ref[...].astype(jnp.float32)
            if activation == "relu":
                acc = jnp.maximum(acc, 0.0)
            if has_residual:
                acc = acc + r_ref[...].astype(jnp.float32)
            o_ref[...] = acc.astype(o_ref.dtype)

    return kernel


def linear_pallas(x2, w_t, bias=None, residual=None, activation="none",
                  compute_dtype=jnp.float32, tm_max=512, tn_max=512,
                  tk_max=1024):
    """y = act(x2 @ w_t + bias) (+ residual).  x2: (M, K), w_t: (K, N)."""
    M, K = x2.shape
    N = w_t.shape[1]
    out_dtype = x2.dtype
    vmem_limit, tile_budget = _vmem_budgets()

    x_item = jnp.dtype(x2.dtype).itemsize
    w_item = jnp.dtype(compute_dtype).itemsize
    o_item = jnp.dtype(out_dtype).itemsize
    r_item = jnp.dtype(residual.dtype).itemsize if residual is not None else 0

    tm = min(tm_max, _round_up(M, 8))
    tn = min(tn_max, _round_up(N, 128))
    tk = K if K <= tk_max else (tk_max // 128) * 128

    def tile_bytes(tm_, tn_, tk_):
        per = tm_ * tk_ * x_item + tk_ * tn_ * w_item + tm_ * tn_ * o_item
        per += tn_ * 4
        if residual is not None:
            per += tm_ * tn_ * r_item
        return 2 * per + tm_ * tn_ * 4          # dbl-buffered I/O + f32 acc

    # Alignment-safe shrinking: K first, then M, then N (all re-rounded).
    while tile_bytes(tm, tn, tk) > tile_budget and tk > 128:
        tk = max(128, (tk // 2) // 128 * 128)
    while tile_bytes(tm, tn, tk) > tile_budget and tm > 8:
        tm = max(8, (tm // 2) // 8 * 8)
    while tile_bytes(tm, tn, tk) > tile_budget and tn > 128:
        tn = max(128, (tn // 2) // 128 * 128)

    m_pad = _round_up(M, tm)
    n_pad = _round_up(N, tn)
    k_pad = _round_up(K, tk)

    x_p = x2
    if m_pad != M or k_pad != K:
        x_p = jnp.pad(x2, ((0, m_pad - M), (0, k_pad - K)))
    w_p = w_t.astype(compute_dtype)
    if k_pad != K or n_pad != N:
        w_p = jnp.pad(w_p, ((0, k_pad - K), (0, n_pad - N)))

    args = [x_p, w_p]
    in_specs = [
        pl.BlockSpec((tm, tk), lambda i, j, k: (i, k)),
        pl.BlockSpec((tk, tn), lambda i, j, k: (k, j)),
    ]
    if bias is not None:
        b_p = bias if n_pad == N else jnp.pad(bias, (0, n_pad - N))
        args.append(b_p.reshape(1, n_pad))
        in_specs.append(pl.BlockSpec((1, tn), lambda i, j, k: (0, j)))
    if residual is not None:
        r_p = residual
        if m_pad != M or n_pad != N:
            r_p = jnp.pad(residual, ((0, m_pad - M), (0, n_pad - N)))
        args.append(r_p)
        in_specs.append(pl.BlockSpec((tm, tn), lambda i, j, k: (i, j)))

    kernel = _make_linear_kernel(bias is not None, residual is not None,
                                 activation, compute_dtype)

    y = pl.pallas_call(
        kernel,
        out_shape=jax.ShapeDtypeStruct((m_pad, n_pad), out_dtype),
        grid_spec=pltpu.PrefetchScalarGridSpec(
            num_scalar_prefetch=0,
            grid=(m_pad // tm, n_pad // tn, k_pad // tk),
            in_specs=in_specs,
            out_specs=pl.BlockSpec((tm, tn), lambda i, j, k: (i, j)),
            scratch_shapes=[pltpu.VMEM((tm, tn), jnp.float32)],
        ),
        compiler_params=pltpu.CompilerParams(
            dimension_semantics=("parallel", "parallel", "arbitrary"),
            vmem_limit_bytes=vmem_limit,
        ),
    )(*args)
    return y[:M, :N]


# -------------------- fused RMSNorm + QKV projection ------------------------

def _rmsnorm_matmul_kernel(x_ref, g_ref, w_ref, o_ref, xn_ref, *, eps):
    # Normalize once per row tile (j == 0) and reuse across the N tiles.
    @pl.when(pl.program_id(1) == 0)
    def _():
        x = x_ref[...].astype(jnp.float32)
        ms = jnp.mean(x * x, axis=-1, keepdims=True)
        xn = x * lax.rsqrt(ms + eps) * g_ref[...].astype(jnp.float32)
        xn_ref[...] = xn.astype(xn_ref.dtype)

    o_ref[...] = jnp.dot(xn_ref[...], w_ref[...],
                         preferred_element_type=jnp.float32).astype(o_ref.dtype)


def rmsnorm_qkv_pallas(x2, gamma, w_t, *, eps, compute_dtype=jnp.float32,
                       tm_max=512, tn_max=512):
    """(rmsnorm(x2) * gamma) @ w_t.  x2: (M, K), w_t: (K, N).  K kept whole."""
    M, K = x2.shape
    N = w_t.shape[1]
    vmem_limit, tile_budget = _vmem_budgets()

    x_item = jnp.dtype(x2.dtype).itemsize
    c_item = jnp.dtype(compute_dtype).itemsize

    tm = min(tm_max, _round_up(M, 8))
    tn = min(tn_max, _round_up(N, 128))

    def tile_bytes(tm_, tn_):
        per = tm_ * K * x_item + K * tn_ * c_item + tm_ * tn_ * x_item + K * 4
        return 2 * per + tm_ * K * c_item       # + xn scratch

    while tile_bytes(tm, tn) > tile_budget and tm > 8:
        tm = max(8, (tm // 2) // 8 * 8)
    while tile_bytes(tm, tn) > tile_budget and tn > 128:
        tn = max(128, (tn // 2) // 128 * 128)

    m_pad = _round_up(M, tm)
    n_pad = _round_up(N, tn)
    x_p = x2 if m_pad == M else jnp.pad(x2, ((0, m_pad - M), (0, 0)))
    w_p = w_t.astype(compute_dtype)
    if n_pad != N:
        w_p = jnp.pad(w_p, ((0, 0), (0, n_pad - N)))

    kernel = functools.partial(_rmsnorm_matmul_kernel, eps=eps)
    y = pl.pallas_call(
        kernel,
        out_shape=jax.ShapeDtypeStruct((m_pad, n_pad), x2.dtype),
        grid_spec=pltpu.PrefetchScalarGridSpec(
            num_scalar_prefetch=0,
            grid=(m_pad // tm, n_pad // tn),
            in_specs=[
                pl.BlockSpec((tm, K), lambda i, j: (i, 0)),
                pl.BlockSpec((1, K), lambda i, j: (0, 0)),
                pl.BlockSpec((K, tn), lambda i, j: (0, j)),
            ],
            out_specs=pl.BlockSpec((tm, tn), lambda i, j: (i, j)),
            scratch_shapes=[pltpu.VMEM((tm, K), compute_dtype)],
        ),
        compiler_params=pltpu.CompilerParams(
            dimension_semantics=("parallel", "arbitrary"),
            vmem_limit_bytes=vmem_limit,
        ),
    )(x_p, gamma.reshape(1, K).astype(jnp.float32), w_p)
    return y[:M, :N]


# --------------------------- attention core ----------------------------------

def _attention_kernel(qkv_ref, m_ref, o_ref, *, D, h, d_k, d_v, scale,
                      compute_dtype, approx_recip):
    qkv = qkv_ref[0]                                # (S, 2D + h*d_v)
    masked = m_ref[0].astype(jnp.float32) == 0.0    # (S, S), exact 0/1 ints

    head_outs = []
    for n in range(h):
        qh = qkv[:, n * d_k:(n + 1) * d_k].astype(compute_dtype)
        kh = qkv[:, D + n * d_k:D + (n + 1) * d_k].astype(compute_dtype)
        vh = qkv[:, 2 * D + n * d_v:2 * D + (n + 1) * d_v].astype(compute_dtype)

        s = lax.dot_general(qh, kh, (((1,), (1,)), ((), ())),
                            preferred_element_type=jnp.float32) * scale
        s = jnp.where(masked, -1e9, s)
        s = s - jnp.max(s, axis=-1, keepdims=True)
        p = jnp.exp(s)
        p = p * pl.reciprocal(jnp.sum(p, axis=-1, keepdims=True),
                              approx=approx_recip)
        head_outs.append(jnp.dot(p.astype(compute_dtype), vh,
                                 preferred_element_type=jnp.float32))

    o_ref[0] = jnp.concatenate(head_outs, axis=-1).astype(o_ref.dtype)


def attention_pallas(qkv3, mask_i8, *, D, h, d_v, compute_dtype=jnp.float32):
    """qkv3: (B, S, 2D + h*d_v) packed q|k|v; mask_i8: (B, S, S) (0 = masked).

    Output written directly in (B, S, h*d_v) layout (lane-dense, no transposes).
    """
    B, S, Nqkv = qkv3.shape
    d_k = D // h
    scale = 1.0 / math.sqrt(d_k)
    vmem_limit, _ = _vmem_budgets()

    kernel = functools.partial(
        _attention_kernel, D=D, h=h, d_k=d_k, d_v=d_v, scale=scale,
        compute_dtype=compute_dtype,
        approx_recip=(compute_dtype != jnp.float32))

    return pl.pallas_call(
        kernel,
        out_shape=jax.ShapeDtypeStruct((B, S, h * d_v), qkv3.dtype),
        grid_spec=pltpu.PrefetchScalarGridSpec(
            num_scalar_prefetch=0,
            grid=(B,),
            in_specs=[
                pl.BlockSpec((1, S, Nqkv), lambda b: (b, 0, 0)),
                pl.BlockSpec((1, S, S), lambda b: (b, 0, 0)),
            ],
            out_specs=pl.BlockSpec((1, S, h * d_v), lambda b: (b, 0, 0)),
        ),
        compiler_params=pltpu.CompilerParams(
            dimension_semantics=("parallel",),
            vmem_limit_bytes=vmem_limit,
        ),
    )(qkv3, mask_i8)


# ---- fused branch: linear + depthwise dilated conv1d + relu-linear + gate ----

def _branch_conv_gate_kernel(x_ref, w1_ref, b1_ref, w2_ref, b2_ref, cw_ref,
                             cb_ref, o_ref, pad_ref, *, d_model, d_conv,
                             dilation, lp, seq_len, compute_dtype):
    C = o_ref.shape[-1]
    xb = x_ref[0]                                       # (S, 2*d_model)
    x1 = xb[:, :d_model].astype(compute_dtype)
    x2 = xb[:, d_model:].astype(compute_dtype)

    first = (jnp.dot(x1, w1_ref[...], preferred_element_type=jnp.float32)
             + b1_ref[...].astype(jnp.float32))         # (S, C)
    second = jnp.maximum(
        jnp.dot(x2, w2_ref[...], preferred_element_type=jnp.float32)
        + b2_ref[...].astype(jnp.float32), 0.0)         # (S, C)

    # Depthwise dilated conv, padding='same', via a zero-padded VMEM scratch.
    pad_ref[...] = jnp.zeros_like(pad_ref)
    pad_ref[lp:lp + seq_len, :] = first
    cw = cw_ref[...].astype(jnp.float32)                # (d_conv, C)
    conv = jnp.broadcast_to(cb_ref[...].astype(jnp.float32), (seq_len, C))
    for j in range(d_conv):                             # small, unrolled
        conv = conv + pad_ref[j * dilation:j * dilation + seq_len, :] * cw[j:j + 1, :]

    o_ref[0] = (conv * second).astype(o_ref.dtype)


def branch_conv_gate_pallas(out3, w1_t, b1, conv_w, conv_b, w2_t, b2, *,
                            d_model, d_conv, dilation,
                            compute_dtype=jnp.float32):
    """out3: (B, S, 2*d_model).  Returns (B, S, d_inner) gated branch output."""
    B, S, D2 = out3.shape
    C = w1_t.shape[1]
    total_pad = dilation * (d_conv - 1)
    lp = total_pad // 2                                  # PyTorch 'same'
    pad_rows = _round_up(S + total_pad, 8)
    vmem_limit, _ = _vmem_budgets()

    kernel = functools.partial(
        _branch_conv_gate_kernel, d_model=d_model, d_conv=d_conv,
        dilation=dilation, lp=lp, seq_len=S, compute_dtype=compute_dtype)

    return pl.pallas_call(
        kernel,
        out_shape=jax.ShapeDtypeStruct((B, S, C), out3.dtype),
        grid_spec=pltpu.PrefetchScalarGridSpec(
            num_scalar_prefetch=0,
            grid=(B,),
            in_specs=[
                pl.BlockSpec((1, S, D2), lambda b: (b, 0, 0)),
                pl.BlockSpec((d_model, C), lambda b: (0, 0)),
                pl.BlockSpec((1, C), lambda b: (0, 0)),
                pl.BlockSpec((d_model, C), lambda b: (0, 0)),
                pl.BlockSpec((1, C), lambda b: (0, 0)),
                pl.BlockSpec((d_conv, C), lambda b: (0, 0)),
                pl.BlockSpec((1, C), lambda b: (0, 0)),
            ],
            out_specs=pl.BlockSpec((1, S, C), lambda b: (b, 0, 0)),
            scratch_shapes=[pltpu.VMEM((pad_rows, C), jnp.float32)],
        ),
        compiler_params=pltpu.CompilerParams(
            dimension_semantics=("parallel",),
            vmem_limit_bytes=vmem_limit,
        ),
    )(out3, w1_t.astype(compute_dtype), b1.reshape(1, C),
      w2_t.astype(compute_dtype), b2.reshape(1, C),
      conv_w, conv_b.reshape(1, C))


# ----------------------------- SAJBlock forward ------------------------------

def saj_block_fwd(x, mask, params, *, h, d_conv, dilation, eps,
                  compute_dtype=jnp.float32):
    """x: (B, S, 2*d_model); mask: (B, S, S) with 0 = masked."""
    B, S, D = x.shape                                    # D = 2 * d_model
    d_model = D // 2
    assert D % h == 0
    d_v2 = params["w_v_t"].shape[1] // h
    M = B * S

    x2 = x.reshape(M, D)

    # --- RMSNorm fused with the packed Q/K/V projection ---
    w_qkv_t = jnp.concatenate(
        [params["w_q_t"], params["w_k_t"], params["w_v_t"]], axis=1)
    qkv = rmsnorm_qkv_pallas(x2, params["gamma"], w_qkv_t, eps=eps,
                             compute_dtype=compute_dtype)
    qkv3 = qkv.reshape(B, S, -1)

    # --- attention (all heads per batch, lane-dense output, int8 mask) ---
    mask_i8 = (mask != 0).astype(jnp.int8)
    attn = attention_pallas(qkv3, mask_i8, D=D, h=h, d_v=d_v2,
                            compute_dtype=compute_dtype)  # (B, S, h*d_v2)

    # --- output projection ---
    out = linear_pallas(attn.reshape(M, h * d_v2), params["w_o_t"],
                        compute_dtype=compute_dtype)      # (M, D), no bias

    # --- fused FirstSection / SecondSection / conv / gate (per batch) ---
    gated = branch_conv_gate_pallas(
        out.reshape(B, S, D), params["w1_t"], params["b1"],
        params["conv_w"], params["conv_b"], params["w2_t"], params["b2"],
        d_model=d_model, d_conv=d_conv, dilation=dilation,
        compute_dtype=compute_dtype)                      # (B, S, d_inner)

    # --- inside projection + residual ---
    y = linear_pallas(gated.reshape(M, -1), params["wp_t"], params["bp"],
                      residual=x2, compute_dtype=compute_dtype)
    return y.reshape(B, S, D)


# ----------------------------- pure JAX reference ----------------------------

def saj_block_ref(x, mask, params, *, h, d_conv, dilation, eps):
    B, S, D = x.shape
    d_model = D // 2
    d_k = D // h

    xn = x * lax.rsqrt(jnp.mean(x * x, axis=-1, keepdims=True) + eps) * params["gamma"]

    q = xn @ params["w_q_t"]
    k = xn @ params["w_k_t"]
    v = xn @ params["w_v_t"]
    d_v2 = v.shape[-1] // h
    q = q.reshape(B, S, h, d_k).transpose(0, 2, 1, 3)
    k = k.reshape(B, S, h, d_k).transpose(0, 2, 1, 3)
    v = v.reshape(B, S, h, d_v2).transpose(0, 2, 1, 3)
    scores = (q @ k.transpose(0, 1, 3, 2)) / math.sqrt(d_k)
    scores = jnp.where(mask[:, None, :, :] == 0.0, -1e9, scores)
    p = jax.nn.softmax(scores, axis=-1)
    attn = (p @ v).transpose(0, 2, 1, 3).reshape(B, S, h * d_v2)
    out = attn @ params["w_o_t"]

    first_half, second_half = out[..., :d_model], out[..., d_model:]

    first_lin = first_half @ params["w1_t"] + params["b1"]
    total_pad = dilation * (d_conv - 1)
    lp = total_pad // 2
    xp = jnp.pad(first_lin, ((0, 0), (lp, total_pad - lp), (0, 0)))
    conv = jnp.zeros_like(first_lin) + params["conv_b"]
    for j in range(d_conv):
        conv = conv + xp[:, j * dilation: j * dilation + S, :] * params["conv_w"][j]

    second = jax.nn.relu(second_half @ params["w2_t"] + params["b2"])
    gated = conv * second
    return x + (gated @ params["wp_t"] + params["bp"])


# ----------------------------- params init -----------------------------------

def init_params(key, d_model, d_inner, d_v, h, d_conv, dtype=jnp.float32):
    D = 2 * d_model
    dv2 = 2 * d_v
    keys = iter(jax.random.split(key, 16))

    def uni(k, shape, fan_in):
        bound = 1.0 / math.sqrt(fan_in)
        return jax.random.uniform(k, shape, dtype, -bound, bound)

    return {
        "gamma": jnp.ones((D,), dtype),
        "w_q_t": uni(next(keys), (D, D), D),
        "w_k_t": uni(next(keys), (D, D), D),
        "w_v_t": uni(next(keys), (D, h * dv2), D),
        "w_o_t": uni(next(keys), (h * dv2, D), h * dv2),
        "w1_t": uni(next(keys), (d_model, d_inner), d_model),
        "b1": uni(next(keys), (d_inner,), d_model),
        "conv_w": uni(next(keys), (d_conv, d_inner), d_conv),
        "conv_b": uni(next(keys), (d_inner,), d_conv),
        "w2_t": uni(next(keys), (d_model, d_inner), d_model),
        "b2": uni(next(keys), (d_inner,), d_model),
        "wp_t": uni(next(keys), (d_inner, D), d_inner),
        "bp": uni(next(keys), (D,), d_inner),
    }


# --------------------------------- main ---------------------------------------

if __name__ == "__main__":
    key = jax.random.PRNGKey(0)
    k_x, k_p = jax.random.split(key)

    B, S = 2, 16
    d_model, d_inner, d_v, h, d_conv = 32, 64, 32, 4, 3
    dilation, eps = 2, 1e-6
    D = 2 * d_model

    params = init_params(k_p, d_model, d_inner, d_v, h, d_conv)
    x = jax.random.normal(k_x, (B, S, D), dtype=jnp.float32)
    # Causal mask (1 = keep, 0 = masked), shared across heads.
    mask = jnp.tile(jnp.tril(jnp.ones((S, S), jnp.float32))[None], (B, 1, 1))

    y_ref = saj_block_ref(x, mask, params, h=h, d_conv=d_conv,
                          dilation=dilation, eps=eps)

    # Strict correctness check: f32 MXU operands.
    fwd_f32 = jax.jit(functools.partial(saj_block_fwd, h=h, d_conv=d_conv,
                                        dilation=dilation, eps=eps,
                                        compute_dtype=jnp.float32))
    y32 = jax.block_until_ready(fwd_f32(x, mask, params))
    assert y32.shape == (B, S, D)
    assert jnp.allclose(y32, y_ref, atol=1e-3, rtol=1e-3), (
        float(jnp.max(jnp.abs(y32 - y_ref))))

    # Performance path: bf16 MXU operands with f32 accumulation
    # (v6e/v7x MXU peak is bf16-only); looser tolerance vs the f32 reference.
    fwd_bf16 = jax.jit(functools.partial(saj_block_fwd, h=h, d_conv=d_conv,
                                         dilation=dilation, eps=eps,
                                         compute_dtype=jnp.bfloat16))
    ybf = jax.block_until_ready(fwd_bf16(x, mask, params))
    assert ybf.shape == (B, S, D)
    assert jnp.allclose(ybf, y_ref, atol=7e-2, rtol=7e-2), (
        float(jnp.max(jnp.abs(ybf - y_ref))))

    print("KERNEL_OK")
</pallas_src>

<mosaic_0001>
module attributes {stable_mosaic.version = 11 : i64} {
  func.func @_rmsnorm_matmul_kernel(%arg0: i32, %arg1: i32, %arg2: memref<32x64xf32, #tpu.memory_space<vmem>>, %arg3: memref<1x64xf32, #tpu.memory_space<vmem>>, %arg4: memref<64x384xf32, #tpu.memory_space<vmem>>, %arg5: memref<32x384xf32, #tpu.memory_space<vmem>>, %arg6: memref<32x64xf32, #tpu.memory_space<vmem>>) attributes {dimension_semantics = [#tpu.dimension_semantics<parallel>, #tpu.dimension_semantics<arbitrary>], iteration_bounds = array<i64: 1, 1>, scalar_prefetch = 0 : i64, scratch_operands = 1 : i64, tpu.core_type = #tpu.core_type<tc>, window_params = [{transform_indices = @transform_0, window_bounds = array<i64: 32, 64>}, {pipeline_mode = #tpu.pipeline_mode<synchronous>, transform_indices = @transform_1, window_bounds = array<i64: 1, 64>}, {transform_indices = @transform_2, window_bounds = array<i64: 64, 384>}, {transform_indices = @transform_3, window_bounds = array<i64: 32, 384>}]} {
    %c0_i32 = arith.constant 0 : i32
    %0 = arith.cmpi eq, %arg1, %c0_i32 : i32
    %1 = arith.extui %0 : i1 to i32
    %c0_i32_0 = arith.constant 0 : i32
    %2 = arith.cmpi ne, %1, %c0_i32_0 : i32
    scf.if %2 {
      %c0_6 = arith.constant 0 : index
      %c0_7 = arith.constant 0 : index
      %7 = vector.load %arg2[%c0_6, %c0_7] : memref<32x64xf32, #tpu.memory_space<vmem>>, vector<32x64xf32>
      %8 = arith.mulf %7, %7 : vector<32x64xf32>
      %cst_8 = arith.constant dense<0.000000e+00> : vector<32xf32>
      %9 = vector.multi_reduction <add>, %8, %cst_8 [1] : vector<32x64xf32> to vector<32xf32>
      %10 = vector.shape_cast %9 : vector<32xf32> to vector<32x1xf32>
      %cst_9 = arith.constant 6.400000e+01 : f32
      %11 = vector.broadcast %cst_9 : f32 to vector<32x1xf32>
      %12 = arith.divf %10, %11 : vector<32x1xf32>
      %cst_10 = arith.constant 9.99999997E-7 : f32
      %13 = vector.broadcast %cst_10 : f32 to vector<32x1xf32>
      %14 = arith.addf %12, %13 : vector<32x1xf32>
      %15 = math.rsqrt %14 : vector<32x1xf32>
      %16 = vector.broadcast %15 : vector<32x1xf32> to vector<32x64xf32>
      %17 = arith.mulf %7, %16 : vector<32x64xf32>
      %c0_11 = arith.constant 0 : index
      %c0_12 = arith.constant 0 : index
      %18 = vector.load %arg3[%c0_11, %c0_12] : memref<1x64xf32, #tpu.memory_space<vmem>>, vector<1x64xf32>
      %19 = vector.broadcast %18 : vector<1x64xf32> to vector<32x64xf32>
      %20 = arith.mulf %17, %19 : vector<32x64xf32>
      %c0_13 = arith.constant 0 : index
      %c0_14 = arith.constant 0 : index
      %21 = vector.load %arg6[%c0_13, %c0_14] : memref<32x64xf32, #tpu.memory_space<vmem>>, vector<32x64xf32>
      tpu.vector_store %arg6[%c0_13, %c0_14], %20 {strides = array<i32>} : memref<32x64xf32, #tpu.memory_space<vmem>>, vector<32x64xf32>,
    } else {
    }
    %c0 = arith.constant 0 : index
    %c0_1 = arith.constant 0 : index
    %3 = vector.load %arg6[%c0, %c0_1] : memref<32x64xf32, #tpu.memory_space<vmem>>, vector<32x64xf32>
    %c0_2 = arith.constant 0 : index
    %c0_3 = arith.constant 0 : index
    %4 = vector.load %arg4[%c0_2, %c0_3] : memref<64x384xf32, #tpu.memory_space<vmem>>, vector<64x384xf32>
    %cst = arith.constant dense<0.000000e+00> : vector<32x384xf32>
    %5 = tpu.matmul %3, %4, %cst {dimension_numbers = #tpu.dot_dimension_numbers<[1], [0], [0], [1], [0, 0, 1, 1], [], []>} : vector<32x64xf32>, vector<64x384xf32>, vector<32x384xf32> -> vector<32x384xf32>
    %c0_4 = arith.constant 0 : index
    %c0_5 = arith.constant 0 : index
    %6 = vector.load %arg5[%c0_4, %c0_5] : memref<32x384xf32, #tpu.memory_space<vmem>>, vector<32x384xf32>
    tpu.vector_store %arg5[%c0_4, %c0_5], %5 {strides = array<i32>} : memref<32x384xf32, #tpu.memory_space<vmem>>, vector<32x384xf32>,
    return
  }
  func.func @transform_0(%arg0: i32, %arg1: i32) -> (i32, i32) {
    %c0_i32 = arith.constant 0 : i32
    %c0_i32_0 = arith.constant 0 : i32
    return %arg0, %c0_i32 : i32, i32
  }
  func.func @transform_1(%arg0: i32, %arg1: i32) -> (i32, i32) {
    %c0_i32 = arith.constant 0 : i32
    %c0_i32_0 = arith.constant 0 : i32
    %c0_i32_1 = arith.constant 0 : i32
    return %c0_i32, %c0_i32_0 : i32, i32
  }
  func.func @transform_2(%arg0: i32, %arg1: i32) -> (i32, i32) {
    %c0_i32 = arith.constant 0 : i32
    %c0_i32_0 = arith.constant 0 : i32
    return %c0_i32, %arg1 : i32, i32
  }
  func.func @transform_3(%arg0: i32, %arg1: i32) -> (i32, i32) {
    %c0_i32 = arith.constant 0 : i32
    return %arg0, %arg1 : i32, i32
  }
}

module attributes {stable_mosaic.version = 11 : i64} {
  func.func @_attention_kernel(%arg0: i32, %arg1: memref<1x16x384xf32, #tpu.memory_space<vmem>>, %arg2: memref<1x16x16xi8, #tpu.memory_space<vmem>>, %arg3: memref<1x16x256xf32, #tpu.memory_space<vmem>>) attributes {dimension_semantics = [#tpu.dimension_semantics<parallel>], iteration_bounds = array<i64: 2>, scalar_prefetch = 0 : i64, scratch_operands = 0 : i64, tpu.core_type = #tpu.core_type<tc>, window_params = [{transform_indices = @transform_0, window_bounds = array<i64: 1, 16, 384>}, {transform_indices = @transform_1, window_bounds = array<i64: 1, 16, 16>}, {transform_indices = @transform_2, window_bounds = array<i64: 1, 16, 256>}]} {
    %c0 = arith.constant 0 : index
    %c0_0 = arith.constant 0 : index
    %c0_1 = arith.constant 0 : index
    %0 = vector.load %arg1[%c0, %c0_0, %c0_1] : memref<1x16x384xf32, #tpu.memory_space<vmem>>, vector<1x16x384xf32>
    %1 = vector.shape_cast %0 : vector<1x16x384xf32> to vector<16x384xf32>
    %c0_2 = arith.constant 0 : index
    %c0_3 = arith.constant 0 : index
    %c0_4 = arith.constant 0 : index
    %2 = vector.load %arg2[%c0_2, %c0_3, %c0_4] : memref<1x16x16xi8, #tpu.memory_space<vmem>>, vector<1x16x16xi8>
    %3 = vector.shape_cast %2 : vector<1x16x16xi8> to vector<16x16xi8>
    %4 = arith.sitofp %3 : vector<16x16xi8> to vector<16x16xf32>
    %cst = arith.constant 0.000000e+00 : f32
    %5 = vector.broadcast %cst : f32 to vector<16x16xf32>
    %6 = arith.cmpf oeq, %4, %5 : vector<16x16xf32>
    %7 = vector.extract_strided_slice %1 {offsets = [0, 0], sizes = [16, 16], strides = [1, 1]} : vector<16x384xf32> to vector<16x16xf32>
    %8 = vector.extract_strided_slice %1 {offsets = [0, 64], sizes = [16, 16], strides = [1, 1]} : vector<16x384xf32> to vector<16x16xf32>
    %9 = vector.extract_strided_slice %1 {offsets = [0, 128], sizes = [16, 64], strides = [1, 1]} : vector<16x384xf32> to vector<16x64xf32>
    %cst_5 = arith.constant dense<0.000000e+00> : vector<16x16xf32>
    %10 = tpu.matmul %7, %8, %cst_5 {dimension_numbers = #tpu.dot_dimension_numbers<[1], [1], [0], [0], [0, 0, 1, 0], [], []>} : vector<16x16xf32>, vector<16x16xf32>, vector<16x16xf32> -> vector<16x16xf32>
    %cst_6 = arith.constant 2.500000e-01 : f32
    %11 = vector.broadcast %cst_6 : f32 to vector<16x16xf32>
    %12 = arith.mulf %10, %11 : vector<16x16xf32>
    %cst_7 = arith.constant -1.000000e+09 : f32
    %13 = vector.broadcast %cst_7 : f32 to vector<16x16xf32>
    %14 = arith.select %6, %13, %12 : vector<16x16xi1>, vector<16x16xf32>
    %cst_8 = arith.constant dense<0xFF800000> : vector<16xf32>
    %15 = vector.multi_reduction <maximumf>, %14, %cst_8 [1] : vector<16x16xf32> to vector<16xf32>
    %16 = vector.shape_cast %15 : vector<16xf32> to vector<16x1xf32>
    %17 = vector.broadcast %16 : vector<16x1xf32> to vector<16x16xf32>
    %18 = arith.subf %14, %17 : vector<16x16xf32>
    %19 = math.exp %18 : vector<16x16xf32>
    %cst_9 = arith.constant dense<0.000000e+00> : vector<16xf32>
    %20 = vector.multi_reduction <add>, %19, %cst_9 [1] : vector<16x16xf32> to vector<16xf32>
    %21 = vector.shape_cast %20 : vector<16xf32> to vector<16x1xf32>
    %22 = tpu.reciprocal %21 : vector<16x1xf32> -> vector<16x1xf32>
    %23 = vector.broadcast %22 : vector<16x1xf32> to vector<16x16xf32>
    %24 = arith.mulf %19, %23 : vector<16x16xf32>
    %cst_10 = arith.constant dense<0.000000e+00> : vector<16x64xf32>
    %25 = tpu.matmul %24, %9, %cst_10 {dimension_numbers = #tpu.dot_dimension_numbers<[1], [0], [0], [1], [0, 0, 1, 1], [], []>} : vector<16x16xf32>, vector<16x64xf32>, vector<16x64xf32> -> vector<16x64xf32>
    %26 = vector.extract_strided_slice %1 {offsets = [0, 16], sizes = [16, 16], strides = [1, 1]} : vector<16x384xf32> to vector<16x16xf32>
    %27 = vector.extract_strided_slice %1 {offsets = [0, 80], sizes = [16, 16], strides = [1, 1]} : vector<16x384xf32> to vector<16x16xf32>
    %28 = vector.extract_strided_slice %1 {offsets = [0, 192], sizes = [16, 64], strides = [1, 1]} : vector<16x384xf32> to vector<16x64xf32>
    %cst_11 = arith.constant dense<0.000000e+00> : vector<16x16xf32>
    %29 = tpu.matmul %26, %27, %cst_11 {dimension_numbers = #tpu.dot_dimension_numbers<[1], [1], [0], [0], [0, 0, 1, 0], [], []>} : vector<16x16xf32>, vector<16x16xf32>, vector<16x16xf32> -> vector<16x16xf32>
    %cst_12 = arith.constant 2.500000e-01 : f32
    %30 = vector.broadcast %cst_12 : f32 to vector<16x16xf32>
    %31 = arith.mulf %29, %30 : vector<16x16xf32>
    %cst_13 = arith.constant -1.000000e+09 : f32
    %32 = vector.broadcast %cst_13 : f32 to vector<16x16xf32>
    %33 = arith.select %6, %32, %31 : vector<16x16xi1>, vector<16x16xf32>
    %cst_14 = arith.constant dense<0xFF800000> : vector<16xf32>
    %34 = vector.multi_reduction <maximumf>, %33, %cst_14 [1] : vector<16x16xf32> to vector<16xf32>
    %35 = vector.shape_cast %34 : vector<16xf32> to vector<16x1xf32>
    %36 = vector.broadcast %35 : vector<16x1xf32> to vector<16x16xf32>
    %37 = arith.subf %33, %36 : vector<16x16xf32>
    %38 = math.exp %37 : vector<16x16xf32>
    %cst_15 = arith.constant dense<0.000000e+00> : vector<16xf32>
    %39 = vector.multi_reduction <add>, %38, %cst_15 [1] : vector<16x16xf32> to vector<16xf32>
    %40 = vector.shape_cast %39 : vector<16xf32> to vector<16x1xf32>
    %41 = tpu.reciprocal %40 : vector<16x1xf32> -> vector<16x1xf32>
    %42 = vector.broadcast %41 : vector<16x1xf32> to vector<16x16xf32>
    %43 = arith.mulf %38, %42 : vector<16x16xf32>
    %cst_16 = arith.constant dense<0.000000e+00> : vector<16x64xf32>
    %44 = tpu.matmul %43, %28, %cst_16 {dimension_numbers = #tpu.dot_dimension_numbers<[1], [0], [0], [1], [0, 0, 1, 1], [], []>} : vector<16x16xf32>, vector<16x64xf32>, vector<16x64xf32> -> vector<16x64xf32>
    %45 = vector.extract_strided_slice %1 {offsets = [0, 32], sizes = [16, 16], strides = [1, 1]} : vector<16x384xf32> to vector<16x16xf32>
    %46 = vector.extract_strided_slice %1 {offsets = [0, 96], sizes = [16, 16], strides = [1, 1]} : vector<16x384xf32> to vector<16x16xf32>
    %47 = vector.extract_strided_slice %1 {offsets = [0, 256], sizes = [16, 64], strides = [1, 1]} : vector<16x384xf32> to vector<16x64xf32>
    %cst_17 = arith.constant dense<0.000000e+00> : vector<16x16xf32>
    %48 = tpu.matmul %45, %46, %cst_17 {dimension_numbers = #tpu.dot_dimension_numbers<[1], [1], [0], [0], [0, 0, 1, 0], [], []>} : vector<16x16xf32>, vector<16x16xf32>, vector<16x16xf32> -> vector<16x16xf32>
    %cst_18 = arith.constant 2.500000e-01 : f32
    %49 = vector.broadcast %cst_18 : f32 to vector<16x16xf32>
    %50 = arith.mulf %48, %49 : vector<16x16xf32>
    %cst_19 = arith.constant -1.000000e+09 : f32
    %51 = vector.broadcast %cst_19 : f32 to vector<16x16xf32>
    %52 = arith.select %6, %51, %50 : vector<16x16xi1>, vector<16x16xf32>
    %cst_20 = arith.constant dense<0xFF800000> : vector<16xf32>
    %53 = vector.multi_reduction <maximumf>, %52, %cst_20 [1] : vector<16x16xf32> to vector<16xf32>
    %54 = vector.shape_cast %53 : vector<16xf32> to vector<16x1xf32>
    %55 = vector.broadcast %54 : vector<16x1xf32> to vector<16x16xf32>
    %56 = arith.subf %52, %55 : vector<16x16xf32>
    %57 = math.exp %56 : vector<16x16xf32>
    %cst_21 = arith.constant dense<0.000000e+00> : vector<16xf32>
    %58 = vector.multi_reduction <add>, %57, %cst_21 [1] : vector<16x16xf32> to vector<16xf32>
    %59 = vector.shape_cast %58 : vector<16xf32> to vector<16x1xf32>
    %60 = tpu.reciprocal %59 : vector<16x1xf32> -> vector<16x1xf32>
    %61 = vector.broadcast %60 : vector<16x1xf32> to vector<16x16xf32>
    %62 = arith.mulf %57, %61 : vector<16x16xf32>
    %cst_22 = arith.constant dense<0.000000e+00> : vector<16x64xf32>
    %63 = tpu.matmul %62, %47, %cst_22 {dimension_numbers = #tpu.dot_dimension_numbers<[1], [0], [0], [1], [0, 0, 1, 1], [], []>} : vector<16x16xf32>, vector<16x64xf32>, vector<16x64xf32> -> vector<16x64xf32>
    %64 = vector.extract_strided_slice %1 {offsets = [0, 48], sizes = [16, 16], strides = [1, 1]} : vector<16x384xf32> to vector<16x16xf32>
    %65 = vector.extract_strided_slice %1 {offsets = [0, 112], sizes = [16, 16], strides = [1, 1]} : vector<16x384xf32> to vector<16x16xf32>
    %66 = vector.extract_strided_slice %1 {offsets = [0, 320], sizes = [16, 64], strides = [1, 1]} : vector<16x384xf32> to vector<16x64xf32>
    %cst_23 = arith.constant dense<0.000000e+00> : vector<16x16xf32>
    %67 = tpu.matmul %64, %65, %cst_23 {dimension_numbers = #tpu.dot_dimension_numbers<[1], [1], [0], [0], [0, 0, 1, 0], [], []>} : vector<16x16xf32>, vector<16x16xf32>, vector<16x16xf32> -> vector<16x16xf32>
    %cst_24 = arith.constant 2.500000e-01 : f32
    %68 = vector.broadcast %cst_24 : f32 to vector<16x16xf32>
    %69 = arith.mulf %67, %68 : vector<16x16xf32>
    %cst_25 = arith.constant -1.000000e+09 : f32
    %70 = vector.broadcast %cst_25 : f32 to vector<16x16xf32>
    %71 = arith.select %6, %70, %69 : vector<16x16xi1>, vector<16x16xf32>
    %cst_26 = arith.constant dense<0xFF800000> : vector<16xf32>
    %72 = vector.multi_reduction <maximumf>, %71, %cst_26 [1] : vector<16x16xf32> to vector<16xf32>
    %73 = vector.shape_cast %72 : vector<16xf32> to vector<16x1xf32>
    %74 = vector.broadcast %73 : vector<16x1xf32> to vector<16x16xf32>
    %75 = arith.subf %71, %74 : vector<16x16xf32>
    %76 = math.exp %75 : vector<16x16xf32>
    %cst_27 = arith.constant dense<0.000000e+00> : vector<16xf32>
    %77 = vector.multi_reduction <add>, %76, %cst_27 [1] : vector<16x16xf32> to vector<16xf32>
    %78 = vector.shape_cast %77 : vector<16xf32> to vector<16x1xf32>
    %79 = tpu.reciprocal %78 : vector<16x1xf32> -> vector<16x1xf32>
    %80 = vector.broadcast %79 : vector<16x1xf32> to vector<16x16xf32>
    %81 = arith.mulf %76, %80 : vector<16x16xf32>
    %cst_28 = arith.constant dense<0.000000e+00> : vector<16x64xf32>
    %82 = tpu.matmul %81, %66, %cst_28 {dimension_numbers = #tpu.dot_dimension_numbers<[1], [0], [0], [1], [0, 0, 1, 1], [], []>} : vector<16x16xf32>, vector<16x64xf32>, vector<16x64xf32> -> vector<16x64xf32>
    %83 = tpu.concatenate %25, %44, %63, %82 in 1 : vector<16x64xf32>, vector<16x64xf32>, vector<16x64xf32>, vector<16x64xf32> -> vector<16x256xf32>
    %c0_29 = arith.constant 0 : index
    %c0_30 = arith.constant 0 : index
    %c0_31 = arith.constant 0 : index
    %84 = vector.load %arg3[%c0_29, %c0_30, %c0_31] : memref<1x16x256xf32, #tpu.memory_space<vmem>>, vector<1x16x256xf32>
    %85 = vector.shape_cast %84 : vector<1x16x256xf32> to vector<16x256xf32>
    %86 = vector.shape_cast %83 : vector<16x256xf32> to vector<1x16x256xf32>
    tpu.vector_store %arg3[%c0_29, %c0_30, %c0_31], %86 {strides = array<i32>} : memref<1x16x256xf32, #tpu.memory_space<vmem>>, vector<1x16x256xf32>,
    return
  }
  func.func @transform_0(%arg0: i32) -> (i32, i32, i32) {
    %c0_i32 = arith.constant 0 : i32
    %c0_i32_0 = arith.constant 0 : i32
    %c0_i32_1 = arith.constant 0 : i32
    return %arg0, %c0_i32, %c0_i32_0 : i32, i32, i32
  }
  func.func @transform_1(%arg0: i32) -> (i32, i32, i32) {
    %c0_i32 = arith.constant 0 : i32
    %c0_i32_0 = arith.constant 0 : i32
    %c0_i32_1 = arith.constant 0 : i32
    return %arg0, %c0_i32, %c0_i32_0 : i32, i32, i32
  }
  func.func @transform_2(%arg0: i32) -> (i32, i32, i32) {
    %c0_i32 = arith.constant 0 : i32
    %c0_i32_0 = arith.constant 0 : i32
    %c0_i32_1 = arith.constant 0 : i32
    return %arg0, %c0_i32, %c0_i32_0 : i32, i32, i32
  }
}

module attributes {stable_mosaic.version = 11 : i64} {
  func.func @kernel(%arg0: i32, %arg1: i32, %arg2: i32, %arg3: memref<32x256xf32, #tpu.memory_space<vmem>>, %arg4: memref<256x128xf32, #tpu.memory_space<vmem>>, %arg5: memref<32x128xf32, #tpu.memory_space<vmem>>, %arg6: memref<32x128xf32, #tpu.memory_space<vmem>>) attributes {dimension_semantics = [#tpu.dimension_semantics<parallel>, #tpu.dimension_semantics<parallel>, #tpu.dimension_semantics<arbitrary>], iteration_bounds = array<i64: 1, 1, 1>, scalar_prefetch = 0 : i64, scratch_operands = 1 : i64, tpu.core_type = #tpu.core_type<tc>, window_params = [{transform_indices = @transform_0, window_bounds = array<i64: 32, 256>}, {transform_indices = @transform_1, window_bounds = array<i64: 256, 128>}, {transform_indices = @transform_2, window_bounds = array<i64: 32, 128>}]} {
    %c0_i32 = arith.constant 0 : i32
    %0 = arith.cmpi eq, %arg2, %c0_i32 : i32
    %1 = arith.extui %0 : i1 to i32
    %c0_i32_0 = arith.constant 0 : i32
    %2 = arith.cmpi ne, %1, %c0_i32_0 : i32
    scf.if %2 {
      %cst_10 = arith.constant 0.000000e+00 : f32
      %12 = vector.broadcast %cst_10 : f32 to vector<32x128xf32>
      %c0_11 = arith.constant 0 : index
      %c0_12 = arith.constant 0 : index
      %13 = vector.load %arg6[%c0_11, %c0_12] : memref<32x128xf32, #tpu.memory_space<vmem>>, vector<32x128xf32>
      tpu.vector_store %arg6[%c0_11, %c0_12], %12 {strides = array<i32>} : memref<32x128xf32, #tpu.memory_space<vmem>>, vector<32x128xf32>,
    } else {
    }
    %c0 = arith.constant 0 : index
    %c0_1 = arith.constant 0 : index
    %3 = vector.load %arg6[%c0, %c0_1] : memref<32x128xf32, #tpu.memory_space<vmem>>, vector<32x128xf32>
    %c0_2 = arith.constant 0 : index
    %c0_3 = arith.constant 0 : index
    %4 = vector.load %arg3[%c0_2, %c0_3] : memref<32x256xf32, #tpu.memory_space<vmem>>, vector<32x256xf32>
    %c0_4 = arith.constant 0 : index
    %c0_5 = arith.constant 0 : index
    %5 = vector.load %arg4[%c0_4, %c0_5] : memref<256x128xf32, #tpu.memory_space<vmem>>, vector<256x128xf32>
    %cst = arith.constant dense<0.000000e+00> : vector<32x128xf32>
    %6 = tpu.matmul %4, %5, %cst {dimension_numbers = #tpu.dot_dimension_numbers<[1], [0], [0], [1], [0, 0, 1, 1], [], []>} : vector<32x256xf32>, vector<256x128xf32>, vector<32x128xf32> -> vector<32x128xf32>
    %7 = arith.addf %3, %6 : vector<32x128xf32>
    %c0_6 = arith.constant 0 : index
    %c0_7 = arith.constant 0 : index
    %8 = vector.load %arg6[%c0_6, %c0_7] : memref<32x128xf32, #tpu.memory_space<vmem>>, vector<32x128xf32>
    tpu.vector_store %arg6[%c0_6, %c0_7], %7 {strides = array<i32>} : memref<32x128xf32, #tpu.memory_space<vmem>>, vector<32x128xf32>,
    %c0_i32_8 = arith.constant 0 : i32
    %9 = arith.cmpi eq, %arg2, %c0_i32_8 : i32
    %10 = arith.extui %9 : i1 to i32
    %c0_i32_9 = arith.constant 0 : i32
    %11 = arith.cmpi ne, %10, %c0_i32_9 : i32
    scf.if %11 {
      %c0_10 = arith.constant 0 : index
      %c0_11 = arith.constant 0 : index
      %12 = vector.load %arg6[%c0_10, %c0_11] : memref<32x128xf32, #tpu.memory_space<vmem>>, vector<32x128xf32>
      %c0_12 = arith.constant 0 : index
      %c0_13 = arith.constant 0 : index
      %13 = vector.load %arg5[%c0_12, %c0_13] : memref<32x128xf32, #tpu.memory_space<vmem>>, vector<32x128xf32>
      tpu.vector_store %arg5[%c0_12, %c0_13], %12 {strides = array<i32>} : memref<32x128xf32, #tpu.memory_space<vmem>>, vector<32x128xf32>,
    } else {
    }
    return
  }
  func.func @transform_0(%arg0: i32, %arg1: i32, %arg2: i32) -> (i32, i32) {
    %c0_i32 = arith.constant 0 : i32
    return %arg0, %arg2 : i32, i32
  }
  func.func @transform_1(%arg0: i32, %arg1: i32, %arg2: i32) -> (i32, i32) {
    %c0_i32 = arith.constant 0 : i32
    return %arg2, %arg1 : i32, i32
  }
  func.func @transform_2(%arg0: i32, %arg1: i32, %arg2: i32) -> (i32, i32) {
    %c0_i32 = arith.constant 0 : i32
    return %arg0, %arg1 : i32, i32
  }
}

module attributes {stable_mosaic.version = 11 : i64} {
  func.func @_branch_conv_gate_kernel(%arg0: i32, %arg1: memref<1x16x64xf32, #tpu.memory_space<vmem>>, %arg2: memref<32x64xf32, #tpu.memory_space<vmem>>, %arg3: memref<1x64xf32, #tpu.memory_space<vmem>>, %arg4: memref<32x64xf32, #tpu.memory_space<vmem>>, %arg5: memref<1x64xf32, #tpu.memory_space<vmem>>, %arg6: memref<3x64xf32, #tpu.memory_space<vmem>>, %arg7: memref<1x64xf32, #tpu.memory_space<vmem>>, %arg8: memref<1x16x64xf32, #tpu.memory_space<vmem>>, %arg9: memref<24x64xf32, #tpu.memory_space<vmem>>) attributes {dimension_semantics = [#tpu.dimension_semantics<parallel>], iteration_bounds = array<i64: 2>, scalar_prefetch = 0 : i64, scratch_operands = 1 : i64, tpu.core_type = #tpu.core_type<tc>, window_params = [{transform_indices = @transform_0, window_bounds = array<i64: 1, 16, 64>}, {pipeline_mode = #tpu.pipeline_mode<synchronous>, transform_indices = @transform_1, window_bounds = array<i64: 32, 64>}, {pipeline_mode = #tpu.pipeline_mode<synchronous>, transform_indices = @transform_2, window_bounds = array<i64: 1, 64>}, {pipeline_mode = #tpu.pipeline_mode<synchronous>, transform_indices = @transform_3, window_bounds = array<i64: 32, 64>}, {pipeline_mode = #tpu.pipeline_mode<synchronous>, transform_indices = @transform_4, window_bounds = array<i64: 1, 64>}, {pipeline_mode = #tpu.pipeline_mode<synchronous>, transform_indices = @transform_5, window_bounds = array<i64: 3, 64>}, {pipeline_mode = #tpu.pipeline_mode<synchronous>, transform_indices = @transform_6, window_bounds = array<i64: 1, 64>}, {transform_indices = @transform_7, window_bounds = array<i64: 1, 16, 64>}]} {
    %c0 = arith.constant 0 : index
    %c0_0 = arith.constant 0 : index
    %c0_1 = arith.constant 0 : index
    %0 = vector.load %arg1[%c0, %c0_0, %c0_1] : memref<1x16x64xf32, #tpu.memory_space<vmem>>, vector<1x16x64xf32>
    %1 = vector.shape_cast %0 : vector<1x16x64xf32> to vector<16x64xf32>
    %2 = vector.extract_strided_slice %1 {offsets = [0, 0], sizes = [16, 32], strides = [1, 1]} : vector<16x64xf32> to vector<16x32xf32>
    %3 = vector.extract_strided_slice %1 {offsets = [0, 32], sizes = [16, 32], strides = [1, 1]} : vector<16x64xf32> to vector<16x32xf32>
    %c0_2 = arith.constant 0 : index
    %c0_3 = arith.constant 0 : index
    %4 = vector.load %arg2[%c0_2, %c0_3] : memref<32x64xf32, #tpu.memory_space<vmem>>, vector<32x64xf32>
    %cst = arith.constant dense<0.000000e+00> : vector<16x64xf32>
    %5 = tpu.matmul %2, %4, %cst {dimension_numbers = #tpu.dot_dimension_numbers<[1], [0], [0], [1], [0, 0, 1, 1], [], []>} : vector<16x32xf32>, vector<32x64xf32>, vector<16x64xf32> -> vector<16x64xf32>
    %c0_4 = arith.constant 0 : index
    %c0_5 = arith.constant 0 : index
    %6 = vector.load %arg3[%c0_4, %c0_5] : memref<1x64xf32, #tpu.memory_space<vmem>>, vector<1x64xf32>
    %7 = vector.broadcast %6 : vector<1x64xf32> to vector<16x64xf32>
    %8 = arith.addf %5, %7 : vector<16x64xf32>
    %c0_6 = arith.constant 0 : index
    %c0_7 = arith.constant 0 : index
    %9 = vector.load %arg4[%c0_6, %c0_7] : memref<32x64xf32, #tpu.memory_space<vmem>>, vector<32x64xf32>
    %cst_8 = arith.constant dense<0.000000e+00> : vector<16x64xf32>
    %10 = tpu.matmul %3, %9, %cst_8 {dimension_numbers = #tpu.dot_dimension_numbers<[1], [0], [0], [1], [0, 0, 1, 1], [], []>} : vector<16x32xf32>, vector<32x64xf32>, vector<16x64xf32> -> vector<16x64xf32>
    %c0_9 = arith.constant 0 : index
    %c0_10 = arith.constant 0 : index
    %11 = vector.load %arg5[%c0_9, %c0_10] : memref<1x64xf32, #tpu.memory_space<vmem>>, vector<1x64xf32>
    %12 = vector.broadcast %11 : vector<1x64xf32> to vector<16x64xf32>
    %13 = arith.addf %10, %12 : vector<16x64xf32>
    %cst_11 = arith.constant 0.000000e+00 : f32
    %14 = vector.broadcast %cst_11 : f32 to vector<16x64xf32>
    %15 = arith.maximumf %13, %14 : vector<16x64xf32>
    %cst_12 = arith.constant 0.000000e+00 : f32
    %16 = vector.broadcast %cst_12 : f32 to vector<24x64xf32>
    %c0_13 = arith.constant 0 : index
    %c0_14 = arith.constant 0 : index
    %17 = vector.load %arg9[%c0_13, %c0_14] : memref<24x64xf32, #tpu.memory_space<vmem>>, vector<24x64xf32>
    tpu.vector_store %arg9[%c0_13, %c0_14], %16 {strides = array<i32>} : memref<24x64xf32, #tpu.memory_space<vmem>>, vector<24x64xf32>,
    %c2 = arith.constant 2 : index
    %c0_15 = arith.constant 0 : index
    %18 = vector.load %arg9[%c2, %c0_15] : memref<24x64xf32, #tpu.memory_space<vmem>>, vector<16x64xf32>
    tpu.vector_store %arg9[%c2, %c0_15], %8 {strides = array<i32>} : memref<24x64xf32, #tpu.memory_space<vmem>>, vector<16x64xf32>,
    %c0_16 = arith.constant 0 : index
    %c0_17 = arith.constant 0 : index
    %19 = vector.load %arg6[%c0_16, %c0_17] : memref<3x64xf32, #tpu.memory_space<vmem>>, vector<3x64xf32>
    %c0_18 = arith.constant 0 : index
    %c0_19 = arith.constant 0 : index
    %20 = vector.load %arg7[%c0_18, %c0_19] : memref<1x64xf32, #tpu.memory_space<vmem>>, vector<1x64xf32>
    %21 = vector.shape_cast %20 : vector<1x64xf32> to vector<1x64xf32>
    %22 = vector.broadcast %21 : vector<1x64xf32> to vector<16x64xf32>
    %c0_20 = arith.constant 0 : index
    %c0_21 = arith.constant 0 : index
    %23 = vector.load %arg9[%c0_20, %c0_21] : memref<24x64xf32, #tpu.memory_space<vmem>>, vector<16x64xf32>
    %24 = vector.extract_strided_slice %19 {offsets = [0, 0], sizes = [1, 64], strides = [1, 1]} : vector<3x64xf32> to vector<1x64xf32>
    %25 = vector.broadcast %24 : vector<1x64xf32> to vector<16x64xf32>
    %26 = arith.mulf %23, %25 : vector<16x64xf32>
    %27 = arith.addf %22, %26 : vector<16x64xf32>
    %c2_22 = arith.constant 2 : index
    %c0_23 = arith.constant 0 : index
    %28 = vector.load %arg9[%c2_22, %c0_23] : memref<24x64xf32, #tpu.memory_space<vmem>>, vector<16x64xf32>
    %29 = vector.extract_strided_slice %19 {offsets = [1, 0], sizes = [1, 64], strides = [1, 1]} : vector<3x64xf32> to vector<1x64xf32>
    %30 = vector.broadcast %29 : vector<1x64xf32> to vector<16x64xf32>
    %31 = arith.mulf %28, %30 : vector<16x64xf32>
    %32 = arith.addf %27, %31 : vector<16x64xf32>
    %c4 = arith.constant 4 : index
    %c0_24 = arith.constant 0 : index
    %33 = vector.load %arg9[%c4, %c0_24] : memref<24x64xf32, #tpu.memory_space<vmem>>, vector<16x64xf32>
    %34 = vector.extract_strided_slice %19 {offsets = [2, 0], sizes = [1, 64], strides = [1, 1]} : vector<3x64xf32> to vector<1x64xf32>
    %35 = vector.broadcast %34 : vector<1x64xf32> to vector<16x64xf32>
    %36 = arith.mulf %33, %35 : vector<16x64xf32>
    %37 = arith.addf %32, %36 : vector<16x64xf32>
    %38 = arith.mulf %37, %15 : vector<16x64xf32>
    %c0_25 = arith.constant 0 : index
    %c0_26 = arith.constant 0 : index
    %c0_27 = arith.constant 0 : index
    %39 = vector.load %arg8[%c0_25, %c0_26, %c0_27] : memref<1x16x64xf32, #tpu.memory_space<vmem>>, vector<1x16x64xf32>
    %40 = vector.shape_cast %39 : vector<1x16x64xf32> to vector<16x64xf32>
    %41 = vector.shape_cast %38 : vector<16x64xf32> to vector<1x16x64xf32>
    tpu.vector_store %arg8[%c0_25, %c0_26, %c0_27], %41 {strides = array<i32>} : memref<1x16x64xf32, #tpu.memory_space<vmem>>, vector<1x16x64xf32>,
    return
  }
  func.func @transform_0(%arg0: i32) -> (i32, i32, i32) {
    %c0_i32 = arith.constant 0 : i32
    %c0_i32_0 = arith.constant 0 : i32
    %c0_i32_1 = arith.constant 0 : i32
    return %arg0, %c0_i32, %c0_i32_0 : i32, i32, i32
  }
  func.func @transform_1(%arg0: i32) -> (i32, i32) {
    %c0_i32 = arith.constant 0 : i32
    %c0_i32_0 = arith.constant 0 : i32
    %c0_i32_1 = arith.constant 0 : i32
    return %c0_i32, %c0_i32_0 : i32, i32
  }
  func.func @transform_2(%arg0: i32) -> (i32, i32) {
    %c0_i32 = arith.constant 0 : i32
    %c0_i32_0 = arith.constant 0 : i32
    %c0_i32_1 = arith.constant 0 : i32
    return %c0_i32, %c0_i32_0 : i32, i32
  }
  func.func @transform_3(%arg0: i32) -> (i32, i32) {
    %c0_i32 = arith.constant 0 : i32
    %c0_i32_0 = arith.constant 0 : i32
    %c0_i32_1 = arith.constant 0 : i32
    return %c0_i32, %c0_i32_0 : i32, i32
  }
  func.func @transform_4(%arg0: i32) -> (i32, i32) {
    %c0_i32 = arith.constant 0 : i32
    %c0_i32_0 = arith.constant 0 : i32
    %c0_i32_1 = arith.constant 0 : i32
    return %c0_i32, %c0_i32_0 : i32, i32
  }
  func.func @transform_5(%arg0: i32) -> (i32, i32) {
    %c0_i32 = arith.constant 0 : i32
    %c0_i32_0 = arith.constant 0 : i32
    %c0_i32_1 = arith.constant 0 : i32
    return %c0_i32, %c0_i32_0 : i32, i32
  }
  func.func @transform_6(%arg0: i32) -> (i32, i32) {
    %c0_i32 = arith.constant 0 : i32
    %c0_i32_0 = arith.constant 0 : i32
    %c0_i32_1 = arith.constant 0 : i32
    return %c0_i32, %c0_i32_0 : i32, i32
  }
  func.func @transform_7(%arg0: i32) -> (i32, i32, i32) {
    %c0_i32 = arith.constant 0 : i32
    %c0_i32_0 = arith.constant 0 : i32
    %c0_i32_1 = arith.constant 0 : i32
    return %arg0, %c0_i32, %c0_i32_0 : i32, i32, i32
  }
}

module attributes {stable_mosaic.version = 11 : i64} {
  func.func @kernel(%arg0: i32, %arg1: i32, %arg2: i32, %arg3: memref<32x64xf32, #tpu.memory_space<vmem>>, %arg4: memref<64x128xf32, #tpu.memory_space<vmem>>, %arg5: memref<1x128xf32, #tpu.memory_space<vmem>>, %arg6: memref<32x128xf32, #tpu.memory_space<vmem>>, %arg7: memref<32x128xf32, #tpu.memory_space<vmem>>, %arg8: memref<32x128xf32, #tpu.memory_space<vmem>>) attributes {dimension_semantics = [#tpu.dimension_semantics<parallel>, #tpu.dimension_semantics<parallel>, #tpu.dimension_semantics<arbitrary>], iteration_bounds = array<i64: 1, 1, 1>, scalar_prefetch = 0 : i64, scratch_operands = 1 : i64, tpu.core_type = #tpu.core_type<tc>, window_params = [{transform_indices = @transform_0, window_bounds = array<i64: 32, 64>}, {transform_indices = @transform_1, window_bounds = array<i64: 64, 128>}, {transform_indices = @transform_2, window_bounds = array<i64: 1, 128>}, {transform_indices = @transform_3, window_bounds = array<i64: 32, 128>}, {transform_indices = @transform_4, window_bounds = array<i64: 32, 128>}]} {
    %c0_i32 = arith.constant 0 : i32
    %0 = arith.cmpi eq, %arg2, %c0_i32 : i32
    %1 = arith.extui %0 : i1 to i32
    %c0_i32_0 = arith.constant 0 : i32
    %2 = arith.cmpi ne, %1, %c0_i32_0 : i32
    scf.if %2 {
      %cst_10 = arith.constant 0.000000e+00 : f32
      %12 = vector.broadcast %cst_10 : f32 to vector<32x128xf32>
      %c0_11 = arith.constant 0 : index
      %c0_12 = arith.constant 0 : index
      %13 = vector.load %arg8[%c0_11, %c0_12] : memref<32x128xf32, #tpu.memory_space<vmem>>, vector<32x128xf32>
      tpu.vector_store %arg8[%c0_11, %c0_12], %12 {strides = array<i32>} : memref<32x128xf32, #tpu.memory_space<vmem>>, vector<32x128xf32>,
    } else {
    }
    %c0 = arith.constant 0 : index
    %c0_1 = arith.constant 0 : index
    %3 = vector.load %arg8[%c0, %c0_1] : memref<32x128xf32, #tpu.memory_space<vmem>>, vector<32x128xf32>
    %c0_2 = arith.constant 0 : index
    %c0_3 = arith.constant 0 : index
    %4 = vector.load %arg3[%c0_2, %c0_3] : memref<32x64xf32, #tpu.memory_space<vmem>>, vector<32x64xf32>
    %c0_4 = arith.constant 0 : index
    %c0_5 = arith.constant 0 : index
    %5 = vector.load %arg4[%c0_4, %c0_5] : memref<64x128xf32, #tpu.memory_space<vmem>>, vector<64x128xf32>
    %cst = arith.constant dense<0.000000e+00> : vector<32x128xf32>
    %6 = tpu.matmul %4, %5, %cst {dimension_numbers = #tpu.dot_dimension_numbers<[1], [0], [0], [1], [0, 0, 1, 1], [], []>} : vector<32x64xf32>, vector<64x128xf32>, vector<32x128xf32> -> vector<32x128xf32>
    %7 = arith.addf %3, %6 : vector<32x128xf32>
    %c0_6 = arith.constant 0 : index
    %c0_7 = arith.constant 0 : index
    %8 = vector.load %arg8[%c0_6, %c0_7] : memref<32x128xf32, #tpu.memory_space<vmem>>, vector<32x128xf32>
    tpu.vector_store %arg8[%c0_6, %c0_7], %7 {strides = array<i32>} : memref<32x128xf32, #tpu.memory_space<vmem>>, vector<32x128xf32>,
    %c0_i32_8 = arith.constant 0 : i32
    %9 = arith.cmpi eq, %arg2, %c0_i32_8 : i32
    %10 = arith.extui %9 : i1 to i32
    %c0_i32_9 = arith.constant 0 : i32
    %11 = arith.cmpi ne, %10, %c0_i32_9 : i32
    scf.if %11 {
      %c0_10 = arith.constant 0 : index
      %c0_11 = arith.constant 0 : index
      %12 = vector.load %arg8[%c0_10, %c0_11] : memref<32x128xf32, #tpu.memory_space<vmem>>, vector<32x128xf32>
      %c0_12 = arith.constant 0 : index
      %c0_13 = arith.constant 0 : index
      %13 = vector.load %arg5[%c0_12, %c0_13] : memref<1x128xf32, #tpu.memory_space<vmem>>, vector<1x128xf32>
      %14 = vector.broadcast %13 : vector<1x128xf32> to vector<32x128xf32>
      %15 = arith.addf %12, %14 : vector<32x128xf32>
      %c0_14 = arith.constant 0 : index
      %c0_15 = arith.constant 0 : index
      %16 = vector.load %arg6[%c0_14, %c0_15] : memref<32x128xf32, #tpu.memory_space<vmem>>, vector<32x128xf32>
      %17 = arith.addf %15, %16 : vector<32x128xf32>
      %c0_16 = arith.constant 0 : index
      %c0_17 = arith.constant 0 : index
      %18 = vector.load %arg7[%c0_16, %c0_17] : memref<32x128xf32, #tpu.memory_space<vmem>>, vector<32x128xf32>
      tpu.vector_store %arg7[%c0_16, %c0_17], %17 {strides = array<i32>} : memref<32x128xf32, #tpu.memory_space<vmem>>, vector<32x128xf32>,
    } else {
    }
    return
  }
  func.func @transform_0(%arg0: i32, %arg1: i32, %arg2: i32) -> (i32, i32) {
    %c0_i32 = arith.constant 0 : i32
    return %arg0, %arg2 : i32, i32
  }
  func.func @transform_1(%arg0: i32, %arg1: i32, %arg2: i32) -> (i32, i32) {
    %c0_i32 = arith.constant 0 : i32
    return %arg2, %arg1 : i32, i32
  }
  func.func @transform_2(%arg0: i32, %arg1: i32, %arg2: i32) -> (i32, i32) {
    %c0_i32 = arith.constant 0 : i32
    %c0_i32_0 = arith.constant 0 : i32
    return %c0_i32, %arg1 : i32, i32
  }
  func.func @transform_3(%arg0: i32, %arg1: i32, %arg2: i32) -> (i32, i32) {
    %c0_i32 = arith.constant 0 : i32
    return %arg0, %arg1 : i32, i32
  }
  func.func @transform_4(%arg0: i32, %arg1: i32, %arg2: i32) -> (i32, i32) {
    %c0_i32 = arith.constant 0 : i32
    return %arg0, %arg1 : i32, i32
  }
}

</mosaic_0001>

<bundles_post_ra>
// kernel: saj_block_fwd.5
= control target key start
LH: loop header
LB: loop body
LE: loop exit
PB: predicated region body
PF: predicated region fallthrough
CT: control target
= control target key end

     0   :  { %vm26_vm0 = vcmask 523264   ;;  %v386_v47 = vmov 0.0   ;;  %s566_s0 = inlined_call_operand.vmem [shape: f32[32,64], index: 0, kind: input, shape index: {}]   ;;  %s567_s2 = inlined_call_operand.vmem [shape: f32[64,384], index: 2, kind: input, shape index: {}]   ;;  %s568_s1 = inlined_call_operand.vmem [shape: f32[1,64], index: 1, kind: input, shape index: {}]   ;;  %s569_s3 = inlined_call_operand.vmem [shape: f32[32,384], index: 3, kind: output, shape index: {}]  }
   0x1   :  { %v410_v0 = vld [vmem:[%s566_s0] sm:$0xff]  ;;  %v415_v1 = vld [vmem:[%s566_s0 + $0x8] sm:$0xff]  ;;  %v420_v2 = vld [vmem:[%s566_s0 + $0x10] sm:$0xff]  ;;  %176 = vmatprep.mubr.f32.mxu0 %v386_v47 }
   0x2   :  { %v22_v3 = vmul.f32 %v410_v0, %v410_v0  ;;  %v23_v4 = vmul.f32 %v415_v1, %v415_v1  ;;  %v24_v5 = vmul.f32 %v420_v2, %v420_v2  ;;  %v431_v6 = vld [vmem:[%s566_s0 + $0x18] sm:$0xff]  ;;  %v76_v12 = vld [vmem:[%s567_s2 + $0x8] sm:$0xff]  ;;  %v79_v13 = vld [vmem:[%s567_s2 + $0x20] sm:$0xff] }
   0x3   :  { %v25_v7 = vmul.f32 %v431_v6, %v431_v6  ;;  %v345_v14 = vpack.c.bf16 %v79_v13, %v76_v12  ;;  %v75_v15 = vld [vmem:[%s567_s2] sm:$0xff]  ;;  %v78_v16 = vld [vmem:[%s567_s2 + $0x18] sm:$0xff]  ;;  %v85_v19 = vld [vmem:[%s567_s2 + $0x50] sm:$0xff] }
   0x4   :  { %v27_v8 = vsel %vm26_vm0, %v22_v3, 0.0  ;;  %v33_v9 = vsel %vm26_vm0, %v24_v5, 0.0  ;;  %v30_v10 = vsel %vm26_vm0, %v23_v4, 0.0  ;;  %v347_v17 = vpack.c.bf16 %v78_v16, %v75_v15  ;;  %v82_v18 = vld [vmem:[%s567_s2 + $0x38] sm:$0xff]  ;;  %v77_v20 = vld [vmem:[%s567_s2 + $0x10] sm:$0xff]  ;;  %v80_v22 = vld [vmem:[%s567_s2 + $0x28] sm:$0xff] }
   0x5   :  { %28 = vadd.xlane.f32.xlu0 %v27_v8  ;;  %34 = vadd.xlane.f32.xlu1 %v33_v9  ;;  %v36_v11 = vsel %vm26_vm0, %v25_v7, 0.0  ;;  %v349_v21 = vpack.c.bf16 %v85_v19, %v82_v18  ;;  %v81_v23 = vld [vmem:[%s567_s2 + $0x30] sm:$0xff]  ;;  %v84_v24 = vld [vmem:[%s567_s2 + $0x48] sm:$0xff]  ;;  %v361_v25 = vpack.c.bf16 %v80_v22, %v77_v20  ;;  %v91_v28 = vld [vmem:[%s567_s2 + $0x80] sm:$0xff] }
   0x6   :  { %346 = vmatprep.subr.bf16.mxu0 %v345_v14  ;;  %v351_v26 = vpack.c.bf16 %v84_v24, %v81_v23  ;;  %v88_v27 = vld [vmem:[%s567_s2 + $0x68] sm:$0xff]  ;;  %v83_v29 = vld [vmem:[%s567_s2 + $0x40] sm:$0xff]  ;;  %v86_v31 = vld [vmem:[%s567_s2 + $0x58] sm:$0xff] }
   0x7   :  { %348 = vmatpush1.bf16.msra.mxu0 %v347_v17  ;;  %362 = vmatprep.subr.bf16.mxu1 %v361_v25  ;;  %v353_v30 = vpack.c.bf16 %v91_v28, %v88_v27  ;;  %v87_v32 = vld [vmem:[%s567_s2 + $0x60] sm:$0xff]  ;;  %v90_v33 = vld [vmem:[%s567_s2 + $0x78] sm:$0xff]  ;;  %v365_v34 = vpack.c.bf16 %v86_v31, %v83_v29  ;;  %v97_v37 = vld [vmem:[%s567_s2 + $0xb0] sm:$0xff] }
   0x8   :  { %350 = vmatprep.subr.bf16.mxu0 %v349_v21  ;;  %364 = vmatpush3.bf16.msra.mxu1 %v361_v25  ;;  %v355_v35 = vpack.c.bf16 %v90_v33, %v87_v32  ;;  %v94_v36 = vld [vmem:[%s567_s2 + $0x98] sm:$0xff]  ;;  %v89_v38 = vld [vmem:[%s567_s2 + $0x70] sm:$0xff]  ;;  %v92_v40 = vld [vmem:[%s567_s2 + $0x88] sm:$0xff] }
   0x9   :  { %31 = vadd.xlane.f32.xlu0 %v30_v10  ;;  %37 = vadd.xlane.f32.xlu1 %v36_v11  ;;  %v357_v39 = vpack.c.bf16 %v97_v37, %v94_v36  ;;  %v93_v41 = vld [vmem:[%s567_s2 + $0x90] sm:$0xff]  ;;  %v96_v42 = vld [vmem:[%s567_s2 + $0xa8] sm:$0xff]  ;;  %v369_v43 = vpack.c.bf16 %v92_v40, %v89_v38  ;;  %v95_v45 = vld [vmem:[%s567_s2 + $0xa0] sm:$0xff] }
   0xa   :  { %366 = vmatprep.subr.bf16.mxu1 %v365_v34  ;;  %v359_v44 = vpack.c.bf16 %v96_v42, %v93_v41  ;;  %v98_v46 = vld [vmem:[%s567_s2 + $0xb8] sm:$0xff]  ;;  %v302_v62 = vld [vmem:[%s568_s1] ss:$0 sm:$0xff] }
   0xb   :  { %352 = vmatpush1.bf16.msra.mxu0 %v351_v26  ;;  %v373_v48 = vpack.c.bf16 %v98_v46, %v95_v45 }
   0xc   :  { %354 = vmatprep.subr.bf16.mxu0 %v353_v30  ;;  %368 = vmatpush3.bf16.msra.mxu1 %v365_v34 }
   0xd   :  { %370 = vmatprep.subr.bf16.mxu1 %v369_v43 }
   0xf   :  { %356 = vmatpush1.bf16.msra.mxu0 %v355_v35 }
  0x10   :  { %358 = vmatprep.subr.bf16.mxu0 %v357_v39  ;;  %372 = vmatpush3.bf16.msra.mxu1 %v369_v43 }
  0x11   :  { %374 = vmatprep.subr.bf16.mxu1 %v373_v48 }
  0x13   :  { %360 = vmatpush1.bf16.msra.mxu0 %v359_v44 }
  0x14   :  { %376 = vmatpush3.bf16.msra.mxu1 %v373_v48 }
  0x92   :  { %v29_v49 = vpop.xlane.xlu0 %28  ;;  %v35_v50 = vpop.xlane.xlu1 %34 }
  0x93   :  { %v40_v51 = vmul.f32 0.015625, %v29_v49  ;;  %v42_v52 = vmul.f32 0.015625, %v35_v50 }
  0x95   :  { %v44_v53 = vadd.f32 1e-06, %v40_v51  ;;  %v46_v54 = vadd.f32 1e-06, %v42_v52 }
  0x96   :  { %v32_v55 = vpop.xlane.xlu0 %31  ;;  %v38_v56 = vpop.xlane.xlu1 %37 }
  0x97   :  { %378 = vrsqrt.f32 %v44_v53  ;;  %v41_v57 = vmul.f32 0.015625, %v32_v55  ;;  %v43_v58 = vmul.f32 0.015625, %v38_v56 }
  0x98   :  { %380 = vrsqrt.f32 %v46_v54 }
  0x99   :  { %v45_v59 = vadd.f32 1e-06, %v41_v57  ;;  %v47_v60 = vadd.f32 1e-06, %v43_v58 }
  0x9b   :  { %382 = vrsqrt.f32 %v45_v59 }
  0x9c   :  { %384 = vrsqrt.f32 %v47_v60 }
  0xa1   :  { %v379_v61 = vpop.eup %378 }
  0xa2   :  { %v381_v63 = vpop.eup %380  ;;  %v52_v3 = vmul.f32 %v379_v61, %v410_v0 }
  0xa3   :  { %v54_v4 = vmul.f32 %v381_v63, %v420_v2 }
  0xa4   :  { %v63_v5 = vmul.f32 %v302_v62, %v52_v3 }
  0xa5   :  { %v383_v7 = vpop.eup %382  ;;  %v65_v8 = vmul.f32 %v302_v62, %v54_v4 }
  0xa6   :  { %v385_v9 = vpop.eup %384  ;;  %67 = vst.msk [vmem:[#allocation2] sm:$0xff] %vm26_vm0, %v63_v5  ;;  %v53_v10 = vmul.f32 %v383_v7, %v415_v1 }
  0xa7   :  { %69 = vst.msk [vmem:[#allocation2 + $0x10] sm:$0xff] %vm26_vm0, %v65_v8  ;;  %v55_v11 = vmul.f32 %v385_v9, %v431_v6 }
  0xa8   :  { %v64_v12 = vmul.f32 %v302_v62, %v53_v10 }
  0xa9   :  { %v66_v13 = vmul.f32 %v302_v62, %v55_v11 }
  0xaa   :  { %68 = vst.msk [vmem:[#allocation2 + $0x8] sm:$0xff] %vm26_vm0, %v64_v12 }
  0xab   :  { %70 = vst.msk [vmem:[#allocation2 + $0x18] sm:$0xff] %vm26_vm0, %v66_v13 }
  0xad   :  { %v71_v0 = vld [vmem:[#allocation2] sm:$0xff] }
  0xae   :  { %303 = vmatmul.mubr.msk.f32.vlgmr.msra.gmra.mrb[0].mxu0 %vm26_vm0, %v71_v0  ;;  %339 = vmatprep.mubr.msk.f32.mxu1 %vm26_vm0, %v71_v0  ;;  %v73_v2 = vld [vmem:[#allocation2 + $0x10] sm:$0xff] }
  0xaf   :  { %182 = vmatprep.mubr.f32.mxu0 %v386_v47 }
  0xb1   :  { %v72_v14 = vld [vmem:[#allocation2 + $0x8] sm:$0xff] }
  0xb2   :  { %304 = vmatmul.mubr.msk.f32.gmra.mrb[2].mxu0 %vm26_vm0, %v72_v14  ;;  %340 = vmatmul.mubr.msk.f32.vlgmr.msra.gmra.mrb[0].mxu1 %vm26_vm0, %v72_v14  ;;  %v74_v1 = vld [vmem:[#allocation2 + $0x18] sm:$0xff] }
  0xb3   :  { %188 = vmatprep.mubr.f32.mxu0 %v386_v47  ;;  %342 = vmatprep.mubr.msk.f32.mxu1 %vm26_vm0, %v73_v2 }
  0xb6   :  { %305 = vmatmul.mubr.msk.f32.gmra.mrb[4].mxu0 %vm26_vm0, %v73_v2  ;;  %343 = vmatmul.mubr.msk.f32.gmra.mrb[2].mxu1 %vm26_vm0, %v74_v1 }
  0xb7   :  { %194 = vmatprep.mubr.f32.mxu0 %v386_v47 }
  0xba   :  { %306 = vmatmul.mubr.msk.f32.gmra.mrb[6].mxu0 %vm26_vm0, %v74_v1 }
 0x181   :  { %v178_v6 = vpop.f32.mrb[0].mxu0 }
 0x182   :  { %286 = vst [vmem:[%s569_s3] sm:$0xff] %v178_v6  ;;  %v180_v15 = vpop.f32.mrb[1].mxu0 }
 0x183   :  { %287 = vst [vmem:[%s569_s3 + $0x8] sm:$0xff] %v180_v15 }
 0x185   :  { %v184_v16 = vpop.f32.mrb[2].mxu0  ;;  %v341_v17 = vpop.f32.mrb[0].mxu1 }
 0x186   :  { %289 = vst [vmem:[%s569_s3 + $0x18] sm:$0xff] %v184_v16  ;;  %291 = vst [vmem:[%s569_s3 + $0x28] sm:$0xff] %v341_v17  ;;  %v186_v18 = vpop.f32.mrb[3].mxu0  ;;  %v267_v19 = vpop.f32.mrb[1].mxu1 }
 0x187   :  { %290 = vst [vmem:[%s569_s3 + $0x20] sm:$0xff] %v186_v18  ;;  %288 = vst [vmem:[%s569_s3 + $0x10] sm:$0xff] %v267_v19 }
 0x189   :  { %v190_v20 = vpop.f32.mrb[4].mxu0  ;;  %v344_v21 = vpop.f32.mrb[2].mxu1 }
 0x18a   :  { %292 = vst [vmem:[%s569_s3 + $0x30] sm:$0xff] %v190_v20  ;;  %v192_v22 = vpop.f32.mrb[5].mxu0  ;;  %297 = vst [vmem:[%s569_s3 + $0x58] sm:$0xff] %v344_v21  ;;  %v277_v23 = vpop.f32.mrb[3].mxu1 }
 0x18b   :  { %293 = vst [vmem:[%s569_s3 + $0x38] sm:$0xff] %v192_v22  ;;  %294 = vst [vmem:[%s569_s3 + $0x40] sm:$0xff] %v277_v23 }
 0x18d   :  { %v196_v24 = vpop.f32.mrb[6].mxu0 }
 0x18e   :  { %295 = vst [vmem:[%s569_s3 + $0x48] sm:$0xff] %v196_v24  ;;  %v198_v25 = vpop.f32.mrb[7].mxu0 }
 0x18f   :  { %296 = vst [vmem:[%s569_s3 + $0x50] sm:$0xff] %v198_v25 }

// kernel: saj_block_fwd.6
= control target key start
LH: loop header
LB: loop body
LE: loop exit
PB: predicated region body
PF: predicated region fallthrough
CT: control target
= control target key end

     0   :  { %s1355_s9 = smov 0   ;;  %s1516_s0 = inlined_call_operand.vmem [shape: f32[2,16,384], index: 0, kind: input, shape index: {}]   ;;  %s1517_s1 = inlined_call_operand.vmem [shape: s8[2,16,16], index: 1, kind: input, shape index: {}]   ;;  %s1518_s2 = inlined_call_operand.vmem [shape: f32[2,16,256], index: 2, kind: output, shape index: {}]  }
   0x1 LB: > { %s1077_s10 = sadd.s32 4294967295, %s1331_s9   ;;  %p1081_p0 = scmp.ge.s32.totalorder %s1331_s9, 1  ;;  %s1331_s9 = sphi %s1355_s9, %s12_s9  }
   0x2   : > { %p122_p1 = scmp.lt.s32.totalorder %s1331_s9, 3 }
   0x4   : > { %p123_p2 = pnand %p1081_p0, %p122_p1 }
   0x5   : > { %p149_p3 = scmp.lt.s32.totalorder (!%p123_p2), %s1077_s10, 1  ;;  %vm184_vm0 = vcmask (!%p123_p2), 130048   ;;  %s1333_s15 = smov (!%p123_p2), 64   ;;  %vm1001_vm4 = vcmask (!%p123_p2), 523264  }
   0x6   : > { %126 = sbr.rel (%p123_p2) target bundleno = 2637 (0xa4d), region = 28  ;;  %vm1387_vm1 = vmpackc.low (!%p123_p2), %vm184_vm0, %vm184_vm0  ;;  %s1334_s20 = smov (!%p123_p2), 48  }
   0x7   : > { %s1335_s21 = smov (!%p123_p2), 112   ;;  %s1336_s22 = smov (!%p123_p2), 96  }
   0x8   : > { %s1337_s23 = smov (!%p123_p2), 32   ;;  %s1338_s24 = smov (!%p123_p2), 80  }
   0x9   : > { %s1339_s25 = smov (!%p123_p2), 16  }
   0xd   : > { %s1522_s10 = smov (!%p149_p3, %s1077_s10), 1 }
   0xe   : > { %s1247_s11 = smul.u32 48, %s1522_s10  ;;  %s1113_s16 = sshll.u32 %s1522_s10, 2 }
   0xf   : > { %s158_s19 = scalar_lea.vmem %s1517_s1, %s1113_s16  ;;  %s1114_s26 = sshll.u32 %s1522_s10, 5 }
  0x10   : > { %s1369_s14 = scalar_lea.vmem %s1516_s0, %s1247_s11  ;;  %v1116_v8 = vld [vmem:[%s158_s19] sm:$0xf]   ;;  %s1492_s29 = scalar_lea.vmem %s1518_s2, %s1114_s26 }
  0x11   : > { %v1372_v0 = vld [vmem:[%s1369_s14] sm:$0xff]  ;;  %v1375_v1 = vld [vmem:[%s1369_s14 + $0x18] sm:$0xff]  ;;  %v1118_v9 = vunpack.c.1.s8 %v1116_v8  ;;  %v1117_v10 = vunpack.c.0.s8 %v1116_v8  ;;  %v165_v21 = vld [vmem:[%s1369_s14 + $0x8] sm:$0xff] }
  0x12   : > { %v1379_v2 = vpack.i.bf16 %v1375_v1, %v1372_v0  ;;  %1155 = vmatprep.mubr.msk.f32.mxu0 %vm184_vm0, %v1372_v0  ;;  %v168_v22 = vld [vmem:[%s1369_s14 + $0x20] sm:$0xff] }
  0x13   : > { %v1401_v11 = vcvt.s32.f32 %v1118_v9  ;;  %v1403_v12 = vcvt.s32.f32 %v1117_v10  ;;  %v1273_v23 = vpack.i.bf16 %v168_v22, %v165_v21  ;;  %v1213_v24 = vpack.c.bf16 %v168_v22, %v165_v21 }
  0x14   : > { %1264 = vrot.lane.b32.xlu0 %v1379_v2, %s1333_s15 }
  0x15   : > { %vm177_vm2 = vcmp.eq.f32.partialorder %v1401_v11, 0.0  ;;  %vm176_vm3 = vcmp.eq.f32.partialorder %v1403_v12, 0.0  ;;  %1214 = vmatprep.subr.bf16.mxu1 %v1213_v24 }
  0x16   : > { %1216 = vmatpush3.bf16.msra.mxu1 %v1213_v24 }
  0x86   : > { %v1265_v3 = vpop.permute.xlu0 %1264 }
  0x87   : > { %v1267_v4 = vunpack.i.h.bf16 %v1265_v3  ;;  %v1266_v5 = vunpack.i.l.bf16 %v1265_v3 }
  0x89   : > { %v1207_v7 = vpack.c.bf16 %v1267_v4, %v1266_v5 }
  0x8b   : > { %1209 = vmatprep.subr.msk.bf16.mxu0 %vm1387_vm1, %v1207_v7 }
  0x8c   : > { %1212 = vmatpush3.bf16.xpose.msk.msra.mxu0 %vm1387_vm1, %v1207_v7 }
  0x93   : > { %1156 = vmatmul.mubr.msk.f32.vlgmr.msra.gmra.mrb[0].mxu0 %vm184_vm0, %v1375_v1 }
 0x166   : > { %v1157_v13 = vpop.f32.mrb[0].mxu0 }
 0x167   : > { %v269_v14 = vmul.f32 0.25, %v1157_v13  ;;  %v259_v15 = vpop.f32.mrb[1].mxu0 }
 0x168   : > { %v268_v16 = vmul.f32 0.25, %v259_v15 }
 0x169   : > { %v271_v17 = vsel %vm177_vm2, -1e+09, %v269_v14 }
 0x16a   : > { %v275_v18 = vsel %vm184_vm0, %v271_v17, -inf  ;;  %v270_v19 = vsel %vm176_vm3, -1e+09, %v268_v16 }
 0x16b   : > { %276 = vmax.xlane.f32.xlu1 %v275_v18  ;;  %v272_v20 = vsel %vm184_vm0, %v270_v19, -inf }
 0x16c   : > { %273 = vmax.xlane.f32.xlu0 %v272_v20 }
 0x17c   : > { %1269 = vrot.lane.b32.xlu1 %v1379_v2, %s1334_s20 }
 0x180   : > { %375 = vrot.lane.b32.xlu1 %v1372_v0, %s1335_s21 }
 0x1f8   : > { %v277_v25 = vpop.xlane.xlu1 %276 }
 0x1f9   : > { %v279_v26 = vsub.f32 %v271_v17, %v277_v25  ;;  %v274_v27 = vpop.xlane.xlu0 %273 }
 0x1fa   : > { %v278_v28 = vsub.f32 %v270_v19, %v274_v27 }
 0x1fb   : > { %v282_v29 = vmul.f32 1.442695, %v279_v26 }
 0x1fc   : > { %v280_v30 = vmul.f32 1.442695, %v278_v28  ;;  %v1270_v31 = vpop.permute.xlu1 %1269 }
 0x1fd   : > { %1293 = vpow2.f32 %v282_v29  ;;  %v1272_v32 = vunpack.i.h.bf16 %v1270_v31  ;;  %v1271_v33 = vunpack.i.l.bf16 %v1270_v31 }
 0x1fe   : > { %1295 = vpow2.f32 %v280_v30 }
 0x1ff   : > { %v1217_v34 = vpack.c.bf16 %v1272_v32, %v1271_v33 }
 0x200   : > { %v376_v39 = vpop.permute.xlu1 %375 }
 0x201   : > { %1219 = vmatprep.subr.msk.bf16.mxu1 %vm1387_vm1, %v1217_v34 }
 0x207   : > { %v1294_v35 = vpop.eup %1293 }
 0x208   : > { %v287_v36 = vsel %vm184_vm0, %v1294_v35, 0.0  ;;  %v1296_v37 = vpop.eup %1295 }
 0x209   : > { %288 = vadd.xlane.f32.xlu1 %v287_v36  ;;  %v284_v38 = vsel %vm184_vm0, %v1296_v37, 0.0 }
 0x20d   : > { %285 = vadd.xlane.f32.xlu1 %v284_v38 }
 0x21e   : > { %377 = vrot.lane.b32.xlu1 %v1375_v1, %s1335_s21 }
 0x296   : > { %v289_v40 = vpop.xlane.xlu1 %288 }
 0x297   : > { %1297 = vrcp.f32 %v289_v40 }
 0x29a   : > { %v286_v41 = vpop.xlane.xlu1 %285 }
 0x29b   : > { %1299 = vrcp.f32 %v286_v41 }
 0x29e   : > { %v378_v46 = vpop.permute.xlu1 %377 }
 0x2a1   : > { %v1298_v42 = vpop.eup %1297 }
 0x2a2   : > { %v293_v45 = vmul.f32 %v1298_v42, %v1294_v35 }
 0x2a5   : > { %v1300_v43 = vpop.eup %1299 }
 0x2a6   : > { %v292_v44 = vmul.f32 %v1300_v43, %v1296_v37 }
 0x2a8   : > { %1162 = vmatprep.mubr.msk.f32.mxu1 %vm184_vm0, %v292_v44 }
 0x2a9   : > { %1163 = vmatmul.mubr.msk.f32.vlgmr.msra.gmra.mrb[0].mxu1 %vm184_vm0, %v293_v45  ;;  %v166_v45 = vld [vmem:[%s1369_s14 + $0x10] sm:$0xff] }
 0x2aa   : > { %1222 = vmatpush3.bf16.xpose.msk.msra.mxu1 %vm1387_vm1, %v1217_v34  ;;  %1169 = vmatprep.mubr.msk.f32.mxu1 %vm184_vm0, %v376_v39 }
 0x2b1   : > { %1170 = vmatmul.mubr.msk.f32.vlgmr.msra.gmra.mrb[2].mxu1 %vm184_vm0, %v378_v46  ;;  %v169_v46 = vld [vmem:[%s1369_s14 + $0x28] sm:$0xff] }
 0x37c   : > { %v1428_v47 = vpop.f32.mrb[0].mxu1 }
 0x37d   : > { %v1430_v48 = vpop.f32.mrb[1].mxu1 }
 0x384   : > { %v1171_v49 = vpop.f32.mrb[2].mxu1 }
 0x385   : > { %v467_v50 = vmul.f32 0.25, %v1171_v49  ;;  %v457_v51 = vpop.f32.mrb[3].mxu1 }
 0x386   : > { %v466_v52 = vmul.f32 0.25, %v457_v51 }
 0x387   : > { %v469_v53 = vsel %vm177_vm2, -1e+09, %v467_v50 }
 0x388   : > { %v473_v54 = vsel %vm184_vm0, %v469_v53, -inf  ;;  %v468_v55 = vsel %vm176_vm3, -1e+09, %v466_v52 }
 0x389   : > { %474 = vmax.xlane.f32.xlu1 %v473_v54  ;;  %v470_v56 = vsel %vm184_vm0, %v468_v55, -inf }
 0x38a   : > { %471 = vmax.xlane.f32.xlu0 %v470_v56 }
 0x39a   : > { %583 = vrot.lane.b32.xlu1 %v1375_v1, %s1336_s22 }
 0x3a0   : > { %1274 = vrot.lane.b32.xlu0 %v1273_v23, %s1333_s15 }
 0x416   : > { %v475_v57 = vpop.xlane.xlu1 %474 }
 0x417   : > { %v477_v58 = vsub.f32 %v469_v53, %v475_v57  ;;  %v472_v59 = vpop.xlane.xlu0 %471 }
 0x418   : > { %v476_v60 = vsub.f32 %v468_v55, %v472_v59 }
 0x419   : > { %v480_v61 = vmul.f32 1.442695, %v477_v58 }
 0x41a   : > { %v478_v62 = vmul.f32 1.442695, %v476_v60  ;;  %v584_v24 = vpop.permute.xlu1 %583 }
 0x41b   : > { %1301 = vpow2.f32 %v480_v61  ;;  %v1275_v63 = vpop.permute.xlu0 %1274 }
 0x41c   : > { %v1277_v3 = vunpack.i.h.bf16 %v1275_v63  ;;  %v1276_v4 = vunpack.i.l.bf16 %v1275_v63  ;;  %1303 = vpow2.f32 %v478_v62 }
 0x41e   : > { %v1223_v5 = vpack.c.bf16 %v1277_v3, %v1276_v4 }
 0x420   : > { %1224 = vmatprep.subr.bf16.mxu0 %v1223_v5 }
 0x421   : > { %1226 = vmatpush3.bf16.msra.mxu0 %v1223_v5 }
 0x425   : > { %v1302_v7 = vpop.eup %1301 }
 0x426   : > { %v485_v8 = vsel %vm184_vm0, %v1302_v7, 0.0  ;;  %v1304_v9 = vpop.eup %1303 }
 0x427   : > { %486 = vadd.xlane.f32.xlu0 %v485_v8  ;;  %v482_v10 = vsel %vm184_vm0, %v1304_v9, 0.0  ;;  %v1288_v8 = vpack.i.bf16 %v169_v46, %v166_v45 }
 0x42b   : > { %483 = vadd.xlane.f32.xlu0 %v482_v10 }
 0x441   : > { %1279 = vrot.lane.b32.xlu0 %v1379_v2, %s1337_s23 }
 0x445   : > { %581 = vrot.lane.b32.xlu0 %v1372_v0, %s1336_s22 }
 0x4b4   : > { %v487_v13 = vpop.xlane.xlu0 %486 }
 0x4b5   : > { %1305 = vrcp.f32 %v487_v13 }
 0x4b8   : > { %v484_v14 = vpop.xlane.xlu0 %483 }
 0x4b9   : > { %1307 = vrcp.f32 %v484_v14 }
 0x4bc   : > { %v1280_v15 = vpop.permute.xlu0 %1279 }
 0x4bd   : > { %v1282_v16 = vunpack.i.h.bf16 %v1280_v15  ;;  %v1281_v17 = vunpack.i.l.bf16 %v1280_v15 }
 0x4bf   : > { %v1227_v18 = vpack.c.bf16 %v1282_v16, %v1281_v17  ;;  %v1306_v19 = vpop.eup %1305 }
 0x4c0   : > { %v491_v22 = vmul.f32 %v1306_v19, %v1302_v7  ;;  %v582_v23 = vpop.permute.xlu0 %581 }
 0x4c1   : > { %1229 = vmatprep.subr.msk.bf16.mxu0 %vm1387_vm1, %v1227_v18 }
 0x4c3   : > { %v1308_v20 = vpop.eup %1307 }
 0x4c4   : > { %v490_v21 = vmul.f32 %v1308_v20, %v1304_v9 }
 0x4c6   : > { %1176 = vmatprep.mubr.msk.f32.mxu0 %vm184_vm0, %v490_v21 }
 0x4c7   : > { %1177 = vmatmul.mubr.msk.f32.vlgmr.msra.gmra.mrb[2].mxu0 %vm184_vm0, %v491_v22 }
 0x4c8   : > { %1232 = vmatpush3.bf16.xpose.msk.msra.mxu0 %vm1387_vm1, %v1227_v18  ;;  %1183 = vmatprep.mubr.msk.f32.mxu0 %vm184_vm0, %v582_v23 }
 0x4cf   : > { %1184 = vmatmul.mubr.msk.f32.vlgmr.msra.gmra.mrb[4].mxu0 %vm184_vm0, %v584_v24 }
 0x59a   : > { %v1452_v25 = vpop.f32.mrb[2].mxu0 }
 0x59b   : > { %v1454_v26 = vpop.f32.mrb[3].mxu0 }
 0x5a2   : > { %v1185_v27 = vpop.f32.mrb[4].mxu0 }
 0x5a3   : > { %v673_v28 = vmul.f32 0.25, %v1185_v27  ;;  %v663_v29 = vpop.f32.mrb[5].mxu0 }
 0x5a4   : > { %v672_v30 = vmul.f32 0.25, %v663_v29 }
 0x5a5   : > { %v675_v31 = vsel %vm177_vm2, -1e+09, %v673_v28 }
 0x5a6   : > { %v679_v32 = vsel %vm184_vm0, %v675_v31, -inf  ;;  %v674_v33 = vsel %vm176_vm3, -1e+09, %v672_v30 }
 0x5a7   : > { %680 = vmax.xlane.f32.xlu1 %v679_v32  ;;  %v676_v34 = vsel %vm184_vm0, %v674_v33, -inf }
 0x5a8   : > { %677 = vmax.xlane.f32.xlu0 %v676_v34 }
 0x5b8   : > { %779 = vrot.lane.b32.xlu1 %v1372_v0, %s1338_s24  ;;  %v1233_v0 = vpack.c.bf16 %v169_v46, %v166_v45 }
 0x5ba   : > { %1234 = vmatprep.subr.bf16.mxu1 %v1233_v0 }
 0x5bb   : > { %1236 = vmatpush3.bf16.msra.mxu1 %v1233_v0 }
 0x634   : > { %v681_v35 = vpop.xlane.xlu1 %680 }
 0x635   : > { %v683_v36 = vsub.f32 %v675_v31, %v681_v35  ;;  %v678_v37 = vpop.xlane.xlu0 %677 }
 0x636   : > { %v682_v38 = vsub.f32 %v674_v33, %v678_v37 }
 0x637   : > { %v686_v39 = vmul.f32 1.442695, %v683_v36 }
 0x638   : > { %v684_v40 = vmul.f32 1.442695, %v682_v38  ;;  %v780_v59 = vpop.permute.xlu1 %779 }
 0x639   : > { %1309 = vpow2.f32 %v686_v39 }
 0x63a   : > { %1311 = vpow2.f32 %v684_v40 }
 0x643   : > { %v1310_v41 = vpop.eup %1309 }
 0x644   : > { %v691_v42 = vsel %vm184_vm0, %v1310_v41, 0.0  ;;  %v1312_v43 = vpop.eup %1311 }
 0x645   : > { %692 = vadd.xlane.f32.xlu0 %v691_v42  ;;  %v688_v44 = vsel %vm184_vm0, %v1312_v43, 0.0 }
 0x649   : > { %689 = vadd.xlane.f32.xlu0 %v688_v44 }
 0x65f   : > { %1284 = vrot.lane.b32.xlu0 %v1379_v2, %s1339_s25 }
 0x663   : > { %781 = vrot.lane.b32.xlu0 %v1375_v1, %s1338_s24 }
 0x6d2   : > { %v693_v49 = vpop.xlane.xlu0 %692 }
 0x6d3   : > { %1313 = vrcp.f32 %v693_v49 }
 0x6d6   : > { %v690_v50 = vpop.xlane.xlu0 %689 }
 0x6d7   : > { %1315 = vrcp.f32 %v690_v50 }
 0x6da   : > { %v1285_v51 = vpop.permute.xlu0 %1284 }
 0x6db   : > { %v1287_v52 = vunpack.i.h.bf16 %v1285_v51  ;;  %v1286_v53 = vunpack.i.l.bf16 %v1285_v51 }
 0x6dd   : > { %v1237_v54 = vpack.c.bf16 %v1287_v52, %v1286_v53  ;;  %v1314_v55 = vpop.eup %1313 }
 0x6de   : > { %v697_v58 = vmul.f32 %v1314_v55, %v1310_v41  ;;  %v782_v1 = vpop.permute.xlu0 %781 }
 0x6df   : > { %1239 = vmatprep.subr.msk.bf16.mxu1 %vm1387_vm1, %v1237_v54 }
 0x6e1   : > { %v1316_v56 = vpop.eup %1315 }
 0x6e2   : > { %v696_v57 = vmul.f32 %v1316_v56, %v1312_v43 }
 0x6e4   : > { %1190 = vmatprep.mubr.msk.f32.mxu1 %vm184_vm0, %v696_v57 }
 0x6e5   : > { %1191 = vmatmul.mubr.msk.f32.vlgmr.msra.gmra.mrb[4].mxu1 %vm184_vm0, %v697_v58 }
 0x6e6   : > { %1242 = vmatpush3.bf16.xpose.msk.msra.mxu1 %vm1387_vm1, %v1237_v54  ;;  %1197 = vmatprep.mubr.msk.f32.mxu1 %vm184_vm0, %v780_v59 }
 0x6ed   : > { %1198 = vmatmul.mubr.msk.f32.vlgmr.msra.gmra.mrb[6].mxu1 %vm184_vm0, %v782_v1 }
 0x7b8   : > { %v1192_v2 = vpop.f32.mrb[4].mxu1 }
 0x7b9   : > { %v1477_v60 = vpop.f32.mrb[5].mxu1 }
 0x7c0   : > { %v1199_v61 = vpop.f32.mrb[6].mxu1 }
 0x7c1   : > { %v871_v62 = vmul.f32 0.25, %v1199_v61  ;;  %v861_v63 = vpop.f32.mrb[7].mxu1 }
 0x7c2   : > { %v870_v3 = vmul.f32 0.25, %v861_v63 }
 0x7c3   : > { %v873_v4 = vsel %vm177_vm2, -1e+09, %v871_v62 }
 0x7c4   : > { %v877_v5 = vsel %vm184_vm0, %v873_v4, -inf  ;;  %v872_v6 = vsel %vm176_vm3, -1e+09, %v870_v3 }
 0x7c5   : > { %878 = vmax.xlane.f32.xlu1 %v877_v5  ;;  %v874_v7 = vsel %vm184_vm0, %v872_v6, -inf }
 0x7c6   : > { %875 = vmax.xlane.f32.xlu0 %v874_v7 }
 0x7d6   : > { %1289 = vrot.lane.b32.xlu1 %v1288_v8, %s1333_s15 }
 0x7da   : > { %989 = vrot.lane.b32.xlu1 %v1452_v25, %s1333_s15 }
 0x852   : > { %v879_v9 = vpop.xlane.xlu1 %878 }
 0x853   : > { %v881_v10 = vsub.f32 %v873_v4, %v879_v9  ;;  %v876_v11 = vpop.xlane.xlu0 %875 }
 0x854   : > { %v880_v13 = vsub.f32 %v872_v6, %v876_v11 }
 0x855   : > { %v884_v14 = vmul.f32 1.442695, %v881_v10 }
 0x856   : > { %v882_v15 = vmul.f32 1.442695, %v880_v13  ;;  %v1290_v16 = vpop.permute.xlu1 %1289 }
 0x857   : > { %v1292_v12 = vunpack.i.h.bf16 %v1290_v16  ;;  %v1291_v17 = vunpack.i.l.bf16 %v1290_v16 }
 0x858   : > { %1317 = vpow2.f32 %v882_v15 }
 0x859   : > { %v1243_v18 = vpack.c.bf16 %v1292_v12, %v1291_v17  ;;  %1319 = vpow2.f32 %v884_v14 }
 0x85a   : > { %v990_v19 = vpop.permute.xlu1 %989 }
 0x85b   : > { %v1003_v20 = vsel %vm1001_vm4, %v1428_v47, %v990_v19  ;;  %1244 = vmatprep.subr.bf16.mxu0 %v1243_v18 }
 0x85c   : > { %1008 = vst [vmem:[%s1492_s29 + $0x10] sm:$0xff] %v1003_v20  ;;  %1246 = vmatpush3.bf16.msra.mxu0 %v1243_v18 }
 0x862   : > { %v1318_v21 = vpop.eup %1317 }
 0x863   : > { %v886_v22 = vsel %vm184_vm0, %v1318_v21, 0.0  ;;  %v1320_v23 = vpop.eup %1319 }
 0x864   : > { %887 = vadd.xlane.f32.xlu0 %v886_v22  ;;  %v889_v24 = vsel %vm184_vm0, %v1320_v23, 0.0 }
 0x868   : > { %890 = vadd.xlane.f32.xlu0 %v889_v24 }
 0x87e   : > { %987 = vrot.lane.b32.xlu0 %v1454_v26, %s1333_s15 }
 0x8f1   : > { %v888_v25 = vpop.xlane.xlu0 %887 }
 0x8f2   : > { %1321 = vrcp.f32 %v888_v25 }
 0x8f5   : > { %v891_v27 = vpop.xlane.xlu0 %890 }
 0x8f6   : > { %1323 = vrcp.f32 %v891_v27 }
 0x8f9   : > { %v988_v47 = vpop.permute.xlu0 %987 }
 0x8fa   : > { %v1002_v28 = vsel %vm1001_vm4, %v1430_v48, %v988_v47 }
 0x8fb   : > { %1006 = vst [vmem:[%s1492_s29] sm:$0xff] %v1002_v28 }
 0x8fc   : > { %v1322_v29 = vpop.eup %1321 }
 0x8fd   : > { %v894_v30 = vmul.f32 %v1322_v29, %v1318_v21 }
 0x8ff   : > { %1204 = vmatprep.mubr.msk.f32.mxu0 %vm184_vm0, %v894_v30 }
 0x900   : > { %v1324_v31 = vpop.eup %1323 }
 0x901   : > { %v895_v32 = vmul.f32 %v1324_v31, %v1320_v23 }
 0x903   : > { %1205 = vmatmul.mubr.msk.f32.vlgmr.msra.gmra.mrb[6].mxu0 %vm184_vm0, %v895_v32 }
 0x9d6   : > { %v1206_v26 = vpop.f32.mrb[6].mxu0 }
 0x9d7   : > { %997 = vrot.lane.b32.xlu0 %v1206_v26, %s1333_s15  ;;  %v976_v33 = vpop.f32.mrb[7].mxu0 }
 0x9d8   : > { %995 = vrot.lane.b32.xlu1 %v976_v33, %s1333_s15 }
 0xa49   : > { %v998_v34 = vpop.permute.xlu0 %997 }
 0xa4a   : > { %v1005_v35 = vsel %vm1001_vm4, %v1192_v2, %v998_v34  ;;  %v996_v48 = vpop.permute.xlu1 %995 }
 0xa4b   : > { %1009 = vst [vmem:[%s1492_s29 + $0x18] sm:$0xff] %v1005_v35  ;;  %v1004_v36 = vsel %vm1001_vm4, %v1477_v60, %v996_v48 }
 0xa4c   : > { %1007 = vst [vmem:[%s1492_s29 + $0x8] sm:$0xff] %v1004_v36 }
 0xa4d PF: > { %s12_s9 = sadd.s32 1, %s1331_s9  }
 0xa4e   : > { %p9_p4 = scmp.ge.s32.totalorder %s12_s9, 4  }
 0xa50   :  { %11 = sbr.rel (!%p9_p4) target bundleno = 1 (0x1), region = 61 }

// kernel: saj_block_fwd.7
= control target key start
LH: loop header
LB: loop body
LE: loop exit
PB: predicated region body
PF: predicated region fallthrough
CT: control target
= control target key end

     0   :  { %s410_s1 = inlined_call_operand.vmem [shape: f32[256,128], index: 1, kind: input, shape index: {}]   ;;  %s411_s0 = inlined_call_operand.vmem [shape: f32[32,256], index: 0, kind: input, shape index: {}]   ;;  %s412_s2 = inlined_call_operand.vmem [shape: f32[32,128], index: 2, kind: output, shape index: {}]  }
   0x1   :  { %v47_v0 = vld [vmem:[%s410_s1 + $0x80] sm:$0xff]  ;;  %v48_v1 = vld [vmem:[%s410_s1 + $0x88] sm:$0xff]  ;;  %v49_v5 = vld [vmem:[%s410_s1 + $0x90] sm:$0xff] }
   0x2   :  { %v31_v2 = vld [vmem:[%s410_s1] sm:$0xff]  ;;  %v215_v3 = vpack.c.bf16 %v48_v1, %v47_v0  ;;  %v32_v4 = vld [vmem:[%s410_s1 + $0x8] sm:$0xff]  ;;  %v50_v6 = vld [vmem:[%s410_s1 + $0x98] sm:$0xff] }
   0x3   :  { %v217_v7 = vpack.c.bf16 %v32_v4, %v31_v2  ;;  %v219_v8 = vpack.c.bf16 %v50_v6, %v49_v5  ;;  %v33_v9 = vld [vmem:[%s410_s1 + $0x10] sm:$0xff]  ;;  %v34_v10 = vld [vmem:[%s410_s1 + $0x18] sm:$0xff]  ;;  %v51_v11 = vld [vmem:[%s410_s1 + $0xa0] sm:$0xff] }
   0x4   :  { %216 = vmatprep.subr.bf16.mxu0 %v215_v3  ;;  %247 = vmatprep.subr.bf16.mxu1 %v215_v3  ;;  %v52_v12 = vld [vmem:[%s410_s1 + $0xa8] sm:$0xff]  ;;  %v221_v13 = vpack.c.bf16 %v34_v10, %v33_v9  ;;  %v35_v15 = vld [vmem:[%s410_s1 + $0x20] sm:$0xff]  ;;  %v53_v17 = vld [vmem:[%s410_s1 + $0xb0] sm:$0xff] }
   0x5   :  { %218 = vmatpush3.bf16.msra.mxu0 %v217_v7  ;;  %255 = vmatpush3.bf16.msra.mxu1 %v217_v7  ;;  %v223_v14 = vpack.c.bf16 %v52_v12, %v51_v11  ;;  %v36_v16 = vld [vmem:[%s410_s1 + $0x28] sm:$0xff]  ;;  %v54_v18 = vld [vmem:[%s410_s1 + $0xb8] sm:$0xff]  ;;  %v37_v21 = vld [vmem:[%s410_s1 + $0x30] sm:$0xff] }
   0x6   :  { %220 = vmatprep.subr.bf16.mxu0 %v219_v8  ;;  %248 = vmatprep.subr.bf16.mxu1 %v219_v8  ;;  %v225_v19 = vpack.c.bf16 %v36_v16, %v35_v15  ;;  %v227_v20 = vpack.c.bf16 %v54_v18, %v53_v17  ;;  %v38_v22 = vld [vmem:[%s410_s1 + $0x38] sm:$0xff]  ;;  %v55_v23 = vld [vmem:[%s410_s1 + $0xc0] sm:$0xff]  ;;  %v56_v24 = vld [vmem:[%s410_s1 + $0xc8] sm:$0xff] }
   0x7   :  { %v24_v25 = vld [vmem:[%s411_s0 + $0x8] sm:$0xff]  ;;  %v229_v27 = vpack.c.bf16 %v38_v22, %v37_v21  ;;  %v231_v28 = vpack.c.bf16 %v56_v24, %v55_v23  ;;  %v39_v29 = vld [vmem:[%s410_s1 + $0x40] sm:$0xff]  ;;  %v57_v31 = vld [vmem:[%s410_s1 + $0xd0] sm:$0xff] }
   0x8   :  { %127 = vmatprep.mubr.f32.mxu0 %v24_v25  ;;  %v28_v26 = vld [vmem:[%s411_s0 + $0x28] sm:$0xff]  ;;  %v58_v32 = vld [vmem:[%s410_s1 + $0xd8] sm:$0xff]  ;;  %v41_v35 = vld [vmem:[%s410_s1 + $0x50] sm:$0xff] }
   0x9   :  { %222 = vmatpush3.bf16.msra.mxu0 %v221_v13  ;;  %256 = vmatpush3.bf16.msra.mxu1 %v221_v13  ;;  %v40_v30 = vld [vmem:[%s410_s1 + $0x48] sm:$0xff]  ;;  %v235_v34 = vpack.c.bf16 %v58_v32, %v57_v31  ;;  %v42_v36 = vld [vmem:[%s410_s1 + $0x58] sm:$0xff]  ;;  %v59_v37 = vld [vmem:[%s410_s1 + $0xe0] sm:$0xff] }
   0xa   :  { %224 = vmatprep.subr.bf16.mxu0 %v223_v14  ;;  %249 = vmatprep.subr.bf16.mxu1 %v223_v14  ;;  %v233_v33 = vpack.c.bf16 %v40_v30, %v39_v29  ;;  %v60_v38 = vld [vmem:[%s410_s1 + $0xe8] sm:$0xff]  ;;  %v237_v39 = vpack.c.bf16 %v42_v36, %v41_v35  ;;  %v43_v41 = vld [vmem:[%s410_s1 + $0x60] sm:$0xff]  ;;  %v61_v43 = vld [vmem:[%s410_s1 + $0xf0] sm:$0xff] }
   0xb   :  { %137 = vmatprep.mubr.f32.mxu1 %v28_v26  ;;  %v239_v40 = vpack.c.bf16 %v60_v38, %v59_v37  ;;  %v44_v42 = vld [vmem:[%s410_s1 + $0x68] sm:$0xff]  ;;  %v62_v44 = vld [vmem:[%s410_s1 + $0xf8] sm:$0xff]  ;;  %v45_v47 = vld [vmem:[%s410_s1 + $0x70] sm:$0xff] }
   0xc   :  { %v241_v45 = vpack.c.bf16 %v44_v42, %v43_v41  ;;  %v243_v46 = vpack.c.bf16 %v62_v44, %v61_v43  ;;  %v46_v48 = vld [vmem:[%s410_s1 + $0x78] sm:$0xff]  ;;  %v23_v50 = vld [vmem:[%s411_s0] sm:$0xff]  ;;  %v25_v54 = vld [vmem:[%s411_s0 + $0x10] sm:$0xff] }
   0xd   :  { %226 = vmatpush3.bf16.msra.mxu0 %v225_v19  ;;  %257 = vmatpush3.bf16.msra.mxu1 %v225_v19  ;;  %v245_v49 = vpack.c.bf16 %v46_v48, %v45_v47  ;;  %v27_v51 = vld [vmem:[%s411_s0 + $0x20] sm:$0xff]  ;;  %v26_v52 = vld [vmem:[%s411_s0 + $0x18] sm:$0xff]  ;;  %v29_v55 = vld [vmem:[%s411_s0 + $0x30] sm:$0xff] }
   0xe   :  { %228 = vmatprep.subr.bf16.mxu0 %v227_v20  ;;  %250 = vmatprep.subr.bf16.mxu1 %v227_v20  ;;  %v30_v53 = vld [vmem:[%s411_s0 + $0x38] sm:$0xff] }
  0x11   :  { %230 = vmatpush3.bf16.msra.mxu0 %v229_v27  ;;  %258 = vmatpush3.bf16.msra.mxu1 %v229_v27 }
  0x12   :  { %232 = vmatprep.subr.bf16.mxu0 %v231_v28  ;;  %251 = vmatprep.subr.bf16.mxu1 %v231_v28 }
  0x15   :  { %234 = vmatpush3.bf16.msra.mxu0 %v233_v33  ;;  %259 = vmatpush3.bf16.msra.mxu1 %v233_v33 }
  0x16   :  { %236 = vmatprep.subr.bf16.mxu0 %v235_v34  ;;  %252 = vmatprep.subr.bf16.mxu1 %v235_v34 }
  0x19   :  { %238 = vmatpush3.bf16.msra.mxu0 %v237_v39  ;;  %260 = vmatpush3.bf16.msra.mxu1 %v237_v39 }
  0x1a   :  { %240 = vmatprep.subr.bf16.mxu0 %v239_v40  ;;  %253 = vmatprep.subr.bf16.mxu1 %v239_v40 }
  0x1d   :  { %242 = vmatpush3.bf16.msra.mxu0 %v241_v45  ;;  %261 = vmatpush3.bf16.msra.mxu1 %v241_v45 }
  0x1e   :  { %244 = vmatprep.subr.bf16.mxu0 %v243_v46  ;;  %254 = vmatprep.subr.bf16.mxu1 %v243_v46 }
  0x21   :  { %246 = vmatpush3.bf16.msra.mxu0 %v245_v49  ;;  %262 = vmatpush3.bf16.msra.mxu1 %v245_v49 }
  0x24   :  { %128 = vmatmul.mubr.f32.vlgmr.msra.gmra.mrb[0].mxu0 %v23_v50  ;;  %138 = vmatmul.mubr.f32.vlgmr.msra.gmra.mrb[0].mxu1 %v27_v51 }
  0x25   :  { %132 = vmatprep.mubr.f32.mxu0 %v26_v52  ;;  %142 = vmatprep.mubr.f32.mxu1 %v30_v53 }
  0x28   :  { %133 = vmatmul.mubr.f32.gmra.mrb[2].mxu0 %v25_v54  ;;  %143 = vmatmul.mubr.f32.gmra.mrb[2].mxu1 %v29_v55 }
  0xf7   :  { %v203_v56 = vpop.f32.mrb[0].mxu0  ;;  %v209_v57 = vpop.f32.mrb[0].mxu1 }
  0xf8   :  { %v204_v58 = vpop.f32.mrb[1].mxu0  ;;  %v210_v59 = vpop.f32.mrb[1].mxu1 }
  0xf9   :  { %v205_v60 = vadd.f32 %v204_v58, %v203_v56  ;;  %v211_v61 = vadd.f32 %v210_v59, %v209_v57 }
  0xfb   :  { %163 = vst [vmem:[%s412_s2] sm:$0xff] %v205_v60  ;;  %165 = vst [vmem:[%s412_s2 + $0x10] sm:$0xff] %v211_v61  ;;  %v206_v62 = vpop.f32.mrb[2].mxu0  ;;  %v212_v63 = vpop.f32.mrb[2].mxu1 }
  0xfc   :  { %v207_v0 = vpop.f32.mrb[3].mxu0  ;;  %v213_v1 = vpop.f32.mrb[3].mxu1 }
  0xfd   :  { %v208_v2 = vadd.f32 %v207_v0, %v206_v62  ;;  %v214_v3 = vadd.f32 %v213_v1, %v212_v63 }
  0xff   :  { %164 = vst [vmem:[%s412_s2 + $0x8] sm:$0xff] %v208_v2  ;;  %166 = vst [vmem:[%s412_s2 + $0x18] sm:$0xff] %v214_v3 }

// kernel: saj_block_fwd.8
= control target key start
LH: loop header
LB: loop body
LE: loop exit
PB: predicated region body
PF: predicated region fallthrough
CT: control target
= control target key end

     0   :  { %s703_s24 = smov 0   ;;  %s774_s0 = inlined_call_operand.vmem [shape: f32[2,16,64], index: 0, kind: input, shape index: {}]   ;;  %s775_s1 = inlined_call_operand.vmem [shape: f32[32,64], index: 1, kind: input, shape index: {}]   ;;  %s776_s2 = inlined_call_operand.vmem [shape: f32[1,64], index: 2, kind: input, shape index: {}]   ;;  %s777_s3 = inlined_call_operand.vmem [shape: f32[32,64], index: 3, kind: input, shape index: {}]   ;;  %s778_s4 = inlined_call_operand.vmem [shape: f32[1,64], index: 4, kind: input, shape index: {}]   ;;  %s779_s5 = inlined_call_operand.vmem [shape: f32[3,64], index: 5, kind: input, shape index: {}]   ;;  %s780_s6 = inlined_call_operand.vmem [shape: f32[1,64], index: 6, kind: input, shape index: {}]   ;;  %s781_s7 = inlined_call_operand.vmem [shape: f32[2,16,64], index: 7, kind: output, shape index: {}]  }
   0x1 LB: > { %s573_s25 = sadd.s32 4294967295, %s659_s24   ;;  %p577_p0 = scmp.ge.s32.totalorder %s659_s24, 1  ;;  %s659_s24 = sphi %s703_s24, %s17_s24  }
   0x2   : > { %p237_p1 = scmp.lt.s32.totalorder %s659_s24, 3 }
   0x4   : > { %p238_p2 = pnand %p577_p0, %p237_p1 }
   0x5   : > { %p269_p3 = scmp.lt.s32.totalorder (!%p238_p2), %s573_s25, 1  ;;  %v281_v0 = vld [vmem:[%s775_s1] sm:$0xff] (!%p238_p2)  ;;  %v282_v1 = vld [vmem:[%s775_s1 + $0x8] sm:$0xff] (!%p238_p2)  ;;  %v283_v2 = vld [vmem:[%s775_s1 + $0x10] sm:$0xff] (!%p238_p2)  ;;  %vm292_vm0 = vcmask (!%p238_p2), 261120   ;;  %s661_s23 = smov (!%p238_p2), 96   ;;  %v486_v22 = vlaneseq (!%p238_p2) }
   0x6   : > { %241 = sbr.rel (%p238_p2) target bundleno = 356 (0x164), region = 48  ;;  %v627_v3 = vpack.c.bf16 (!%p238_p2), %v282_v1, %v281_v0  ;;  %v284_v4 = vld [vmem:[%s775_s1 + $0x18] sm:$0xff] (!%p238_p2)  ;;  %v374_v5 = vld [vmem:[%s777_s3] sm:$0xff] (!%p238_p2)  ;;  %v375_v6 = vld [vmem:[%s777_s3 + $0x8] sm:$0xff] (!%p238_p2)  ;;  %vm470_vm1 = vcmask (!%p238_p2), 523264   ;;  %v662_v14 = vmov (!%p238_p2), 0.0  }
   0x7   : > { %v631_v7 = vpack.c.bf16 (!%p238_p2), %v284_v4, %v283_v2  ;;  %v635_v8 = vpack.c.bf16 (!%p238_p2), %v375_v6, %v374_v5  ;;  %v376_v9 = vld [vmem:[%s777_s3 + $0x10] sm:$0xff] (!%p238_p2)  ;;  %v377_v10 = vld [vmem:[%s777_s3 + $0x18] sm:$0xff] (!%p238_p2)  ;;  %472 = vst.msk [vmem:[#allocation2 + $0x8] sm:$0xff] (!%p238_p2), %vm470_vm1, %v662_v14  ;;  %473 = vst.msk [vmem:[#allocation2 + $0x10] sm:$0xff] (!%p238_p2), %vm470_vm1, %v662_v14  ;;  %v487_v23 = vshrl.u32 (!%p238_p2), %v486_v22, 7 }
   0x8   : > { %628 = vmatprep.subr.bf16.mxu0 (!%p238_p2), %v627_v3  ;;  %v639_v11 = vpack.c.bf16 (!%p238_p2), %v377_v10, %v376_v9  ;;  %471 = vst.msk [vmem:[#allocation2] sm:$0xff] (!%p238_p2), %vm470_vm1, %v662_v14  ;;  %v582_v17 = vld [vmem:[%s776_s2] ss:$0 sm:$0xff] (!%p238_p2) }
   0x9   : > { %630 = vmatpush3.bf16.msra.mxu0 (!%p238_p2), %v627_v3  ;;  %636 = vmatprep.subr.bf16.mxu1 (!%p238_p2), %v635_v8  ;;  %v488_v24 = vsub.s32 (!%p238_p2), 0, %v487_v23  ;;  %v476_v25 = vld [vmem:[%s779_s5] sm:$0x7] (!%p238_p2)  ;;  %v498_v27 = vsub.s32 (!%p238_p2), 1, %v487_v23  ;;  %v508_v32 = vsub.s32 (!%p238_p2), 2, %v487_v23 }
   0xa   : > { %632 = vmatprep.subr.bf16.mxu0 (!%p238_p2), %v631_v7  ;;  %638 = vmatpush3.bf16.msra.mxu1 (!%p238_p2), %v635_v8  ;;  %v588_v33 = vld [vmem:[%s780_s6] ss:$0 sm:$0xff] (!%p238_p2) }
   0xb   : > { %640 = vmatprep.subr.bf16.mxu1 (!%p238_p2), %v639_v11  ;;  %v489_v26 = vrot.slane (!%p238_p2), %v476_v25, %v488_v24  ;;  %v499_v31 = vrot.slane (!%p238_p2), %v476_v25, %v498_v27  ;;  %v509_v39 = vrot.slane (!%p238_p2), %v476_v25, %v508_v32  ;;  %v585_v44 = vld [vmem:[%s778_s4] ss:$0 sm:$0xff] (!%p238_p2) }
   0xd   : > { %s783_s25 = smov (!%p269_p3, %s573_s25), 1  ;;  %634 = vmatpush3.bf16.msra.mxu0 %v631_v7 }
   0xe   : > { %s591_s19 = sshll.u32 %s783_s25, 4  ;;  %642 = vmatpush3.bf16.msra.mxu1 %v639_v11 }
   0xf   : > { %s273_s22 = scalar_lea.vmem %s774_s0, %s591_s19  ;;  %s278_s13 = scalar_lea.vmem %s781_s7, %s591_s19 }
  0x10   : > { %v279_v12 = vld [vmem:[%s273_s22] sm:$0xff]  ;;  %v280_v13 = vld [vmem:[%s273_s22 + $0x8] sm:$0xff] }
  0x11   : > { %385 = vrot.lane.b32.xlu0 %v279_v12, %s661_s23  ;;  %613 = vmatprep.mubr.msk.f32.mxu0 %vm292_vm0, %v279_v12 }
  0x12   : > { %614 = vmatmul.mubr.msk.f32.vlgmr.msra.gmra.mrb[0].mxu0 %vm292_vm0, %v280_v13 }
  0x15   : > { %387 = vrot.lane.b32.xlu0 %v280_v13, %s661_s23 }
  0x83   : > { %v386_v15 = vpop.permute.xlu0 %385 }
  0x84   : > { %624 = vmatprep.mubr.msk.f32.mxu1 %vm292_vm0, %v386_v15 }
  0x87   : > { %v388_v16 = vpop.permute.xlu0 %387 }
  0x88   : > { %625 = vmatmul.mubr.msk.f32.vlgmr.msra.gmra.mrb[0].mxu1 %vm292_vm0, %v388_v16 }
  0xe5   : > { %v615_v18 = vpop.f32.mrb[0].mxu0 }
  0xe6   : > { %v371_v19 = vadd.f32 %v615_v18, %v582_v17  ;;  %v365_v20 = vpop.f32.mrb[1].mxu0 }
  0xe7   : > { %v366_v21 = vadd.f32 %v582_v17, %v365_v20 }
  0xe8   : > { %475 = vst.msk [vmem:[#allocation2 + $0xa] sm:$0xff] %vm470_vm1, %v371_v19 }
  0xe9   : > { %474 = vst.msk [vmem:[#allocation2 + $0x2] sm:$0xff] %vm470_vm1, %v366_v21 }
  0xef   : > { %v495_v34 = vld [vmem:[#allocation2 + $0xa] sm:$0xff] }
  0xf0   : > { %v485_v28 = vld [vmem:[#allocation2 + $0x8] sm:$0xff]  ;;  %v484_v29 = vld [vmem:[#allocation2] sm:$0xff]  ;;  %v501_v38 = vmul.f32 %v499_v31, %v495_v34 }
  0xf1   : > { %v491_v30 = vmul.f32 %v489_v26, %v485_v28  ;;  %v490_v35 = vmul.f32 %v489_v26, %v484_v29  ;;  %v494_v36 = vld [vmem:[#allocation2 + $0x2] sm:$0xff]  ;;  %v505_v40 = vld [vmem:[#allocation2 + $0xc] sm:$0xff] }
  0xf2   : > { %v500_v42 = vmul.f32 %v499_v31, %v494_v36  ;;  %v504_v43 = vld [vmem:[#allocation2 + $0x4] sm:$0xff]  ;;  %v511_v46 = vmul.f32 %v509_v39, %v505_v40 }
  0xf3   : > { %v493_v37 = vadd.f32 %v588_v33, %v491_v30  ;;  %v492_v41 = vadd.f32 %v588_v33, %v490_v35  ;;  %v510_v49 = vmul.f32 %v509_v39, %v504_v43 }
  0xf5   : > { %v503_v45 = vadd.f32 %v501_v38, %v493_v37  ;;  %v502_v48 = vadd.f32 %v500_v42, %v492_v41 }
  0xf7   : > { %v513_v54 = vadd.f32 %v511_v46, %v503_v45  ;;  %v512_v56 = vadd.f32 %v510_v49, %v502_v48 }
 0x15b   : > { %v626_v47 = vpop.f32.mrb[0].mxu1 }
 0x15c   : > { %v465_v50 = vadd.f32 %v626_v47, %v585_v44  ;;  %v459_v51 = vpop.f32.mrb[1].mxu1 }
 0x15d   : > { %v460_v52 = vadd.f32 %v585_v44, %v459_v51 }
 0x15e   : > { %v469_v53 = vmax.f32 %v465_v50, 0.0 }
 0x15f   : > { %v468_v55 = vmax.f32 %v460_v52, 0.0 }
 0x160   : > { %v515_v57 = vmul.f32 %v513_v54, %v469_v53 }
 0x161   : > { %v514_v58 = vmul.f32 %v512_v56, %v468_v55 }
 0x162   : > { %517 = vst.msk [vmem:[%s278_s13 + $0x8] sm:$0xff] %vm470_vm1, %v515_v57 }
 0x163   : > { %516 = vst.msk [vmem:[%s278_s13] sm:$0xff] %vm470_vm1, %v514_v58 }
 0x164 PF: > { %s17_s24 = sadd.s32 1, %s659_s24  }
 0x165   : > { %p14_p4 = scmp.ge.s32.totalorder %s17_s24, 4  }
 0x167   :  { %16 = sbr.rel (!%p14_p4) target bundleno = 1 (0x1), region = 78 }

// kernel: saj_block_fwd.9
= control target key start
LH: loop header
LB: loop body
LE: loop exit
PB: predicated region body
PF: predicated region fallthrough
CT: control target
= control target key end

     0   :  { %vm42_vm0 = vcmask 523264   ;;  %s379_s0 = inlined_call_operand.vmem [shape: f32[32,64], index: 0, kind: input, shape index: {}]   ;;  %s380_s1 = inlined_call_operand.vmem [shape: f32[64,128], index: 1, kind: input, shape index: {}]   ;;  %s381_s2 = inlined_call_operand.vmem [shape: f32[1,128], index: 2, kind: input, shape index: {}]   ;;  %s382_s3 = inlined_call_operand.vmem [shape: f32[32,128], index: 3, kind: input, shape index: {}]   ;;  %s383_s4 = inlined_call_operand.hbm [shape: f32[32,128], index: 4, kind: output, shape index: {}]  }
   0x1   :  { %v34_v0 = vld [vmem:[%s380_s1] sm:$0xff]  ;;  %v35_v1 = vld [vmem:[%s380_s1 + $0x8] sm:$0xff]  ;;  %v36_v2 = vld [vmem:[%s380_s1 + $0x10] sm:$0xff] }
   0x2   :  { %v233_v3 = vpack.c.bf16 %v35_v1, %v34_v0  ;;  %v37_v4 = vld [vmem:[%s380_s1 + $0x18] sm:$0xff]  ;;  %v38_v6 = vld [vmem:[%s380_s1 + $0x20] sm:$0xff]  ;;  %v39_v7 = vld [vmem:[%s380_s1 + $0x28] sm:$0xff] }
   0x3   :  { %v237_v5 = vpack.c.bf16 %v37_v4, %v36_v2  ;;  %v30_v8 = vld [vmem:[%s379_s0] sm:$0xff]  ;;  %v32_v9 = vld [vmem:[%s379_s0 + $0x10] sm:$0xff] }
   0x4   :  { %234 = vmatprep.subr.bf16.mxu0 %v233_v3  ;;  %249 = vmatprep.subr.bf16.mxu1 %v233_v3 }
   0x5   :  { %236 = vmatpush3.bf16.msra.mxu0 %v233_v3  ;;  %253 = vmatpush3.bf16.msra.mxu1 %v233_v3 }
   0x6   :  { %9 = vsyncpa [#allocation4], 0  ;;  %238 = vmatprep.subr.bf16.mxu0 %v237_v5  ;;  %250 = vmatprep.subr.bf16.mxu1 %v237_v5  ;;  %v241_v10 = vpack.c.bf16 %v39_v7, %v38_v6  ;;  %v40_v11 = vld [vmem:[%s380_s1 + $0x30] sm:$0xff]  ;;  %v41_v12 = vld [vmem:[%s380_s1 + $0x38] sm:$0xff]  ;;  %s284_s18 = smov [#allocation3]  }
   0x7   :  { %227 = vmatprep.mubr.msk.f32.mxu0 %vm42_vm0, %v30_v8  ;;  %230 = vmatprep.mubr.msk.f32.mxu1 %vm42_vm0, %v32_v9  ;;  %v245_v13 = vpack.c.bf16 %v41_v12, %v40_v11  ;;  %v31_v14 = vld [vmem:[%s379_s0 + $0x8] sm:$0xff]  ;;  %v33_v15 = vld [vmem:[%s379_s0 + $0x18] sm:$0xff]  ;;  %v198_v16 = vld [vmem:[%s381_s2] ss:$0 sm:$0xff]  ;;  %s183_s0 = sshll.u32 %s284_s18, 4  ;;  %s184_s0 = int_to_ptr.vmem [resolvable:$true] %s183_s0 }
   0x8   :  { %v167_v18 = vld [vmem:[%s382_s3 + $0x8] sm:$0xff]  ;;  %v169_v20 = vld [vmem:[%s382_s3 + $0x18] sm:$0xff]  ;;  %v166_v24 = vld [vmem:[%s382_s3] sm:$0xff]  ;;  %s260_s22 = scalar_lea.vmem %s184_s0, 512  ;;  %p265_p1 = scmp.lt.s32.totalorder %s184_s0, %s184_s0 }
   0x9   :  { %240 = vmatpush3.bf16.msra.mxu0 %v237_v5  ;;  %254 = vmatpush3.bf16.msra.mxu1 %v237_v5  ;;  %v168_v26 = vld [vmem:[%s382_s3 + $0x10] sm:$0xff]  ;;  %p261_p0 = scmp.ne.s32.totalorder %s184_s0, %s260_s22  ;;  %p266_p2 = scmp.lt.s32.totalorder %s260_s22, %s260_s22 }
   0xa   :  { %242 = vmatprep.subr.bf16.mxu0 %v241_v10  ;;  %251 = vmatprep.subr.bf16.mxu1 %v241_v10 }
   0xb   :  { %p267_p3 = por %p266_p2, %p265_p1 }
   0xd   :  { %244 = vmatpush3.bf16.msra.mxu0 %v241_v10  ;;  %255 = vmatpush3.bf16.msra.mxu1 %v241_v10  ;;  %p268_p4 = pnand %p267_p3, %p261_p0 }
   0xe   :  { %246 = vmatprep.subr.bf16.mxu0 %v245_v13  ;;  %252 = vmatprep.subr.bf16.mxu1 %v245_v13 }
  0x11   :  { %248 = vmatpush3.bf16.msra.mxu0 %v245_v13  ;;  %256 = vmatpush3.bf16.msra.mxu1 %v245_v13 }
  0x14   :  { %228 = vmatmul.mubr.msk.f32.vlgmr.msra.gmra.mrb[0].mxu0 %vm42_vm0, %v31_v14  ;;  %231 = vmatmul.mubr.msk.f32.vlgmr.msra.gmra.mrb[0].mxu1 %vm42_vm0, %v33_v15 }
  0xe7   :  { %v229_v17 = vpop.f32.mrb[0].mxu0  ;;  %v232_v19 = vpop.f32.mrb[0].mxu1 }
  0xe8   :  { %v163_v21 = vadd.f32 %v229_v17, %v198_v16  ;;  %v165_v22 = vadd.f32 %v232_v19, %v198_v16  ;;  %v121_v23 = vpop.f32.mrb[1].mxu0  ;;  %v131_v25 = vpop.f32.mrb[1].mxu1 }
  0xe9   :  { %v162_v27 = vadd.f32 %v198_v16, %v121_v23  ;;  %v164_v28 = vadd.f32 %v198_v16, %v131_v25 }
  0xea   :  { %v171_v29 = vadd.f32 %v167_v18, %v163_v21  ;;  %v173_v30 = vadd.f32 %v169_v20, %v165_v22 }
  0xeb   :  { %v170_v31 = vadd.f32 %v166_v24, %v162_v27  ;;  %v172_v32 = vadd.f32 %v168_v26, %v164_v28 }
  0xec   :  { %175 = vst [vmem:[#allocation3 + $0x8] sm:$0xff] %v171_v29  ;;  %177 = vst [vmem:[#allocation3 + $0x18] sm:$0xff] %v173_v30 }
  0xed   :  { %174 = vst [vmem:[#allocation3] sm:$0xff] %v170_v31  ;;  %176 = vst [vmem:[#allocation3 + $0x10] sm:$0xff] %v172_v32 }
  0xee   :  { %271 = shalt.err (!%p268_p4)
}
  0xef   :  { %s272_s24 = scalar_lea.hbm %s383_s4, 512 }
  0xf0   :  { %p273_p5 = scmp.ne.s32.totalorder %s383_s4, %s272_s24  ;;  %p276_p6 = scmp.lt.u32.totalorder %s272_s24, %s383_s4 }
  0xf2   :  { %p278_p7 = pnand %p276_p6, %p273_p5 }
  0xf4   :  { %281 = shalt.err (!%p278_p7)
}
  0xf5   :  { %s285_s29 = smov 128   ;;  %s286_s30 = smov 8  }
  0xf6   :  { %189 = dma.vmem_to_hbm [thread:$0]  %s184_s0, 512, %s383_s4, [#allocation4], %s285_s29, %s285_s29, %s286_s30  }
  0xf7   :  { %282 = dma.done.wait [#allocation4], 512  }
  0xf8   :  { %283 = vsyncadd [#allocation4], 4294966784 }
  0xf9   :  { %193 = vsyncpa [#allocation4], 1 }

</bundles_post_ra>
